<compile_context>
chip_gen: v7x
topology: tpu7x:2x2x1
jax: 0.10.0
libtpu: 0.0.40
codegen_flags: <defaults>
</compile_context>

<pallas_src>
import functools
import math

import jax
import jax.numpy as jnp
from jax.experimental import pallas as pl
from jax.experimental.pallas import tpu as pltpu


# ------------------------------ fused forward kernel ------------------------------
def _fused_kernel(*refs, T, Bp, B_real, H, num_layers):
    # refs layout:
    #   refs[0]                      x_flat   (T*Bp, I)   time-major, batch-padded
    #   refs[1 + 3l .. 3l+3]         per layer: w_ih^T (in,4H), w_hh^T (H,4H), b (1,4H)
    #   then                         gamma (1,H), beta (1,H), w_fc^T (H,O), b_fc (1,O)
    #   then                         out_ref (Bp, O), seq_scr (T*Bp, H) VMEM scratch
    x_ref = refs[0]
    layer_refs = refs[1:1 + 3 * num_layers]
    gamma_ref, beta_ref, wfc_ref, bfc_ref, out_ref, seq_scr = refs[1 + 3 * num_layers:]

    cur_in = x_ref[...]                           # (T*Bp, in_dim) layer input
    hn = None
    for layer in range(num_layers):
        wih = layer_refs[3 * layer][...]          # (in_dim, 4H)
        whh = layer_refs[3 * layer + 1][...]      # (H, 4H)
        b = layer_refs[3 * layer + 2][...]        # (1, 4H)

        # Hoisted input projection: one batched MXU matmul over all timesteps.
        xproj = jnp.dot(cur_in, wih, preferred_element_type=jnp.float32) + b

        h = jnp.zeros((Bp, H), jnp.float32)
        c = jnp.zeros((Bp, H), jnp.float32)
        for t in range(T):                        # fully unrolled (T is small)
            gates = xproj[t * Bp:(t + 1) * Bp, :] + jnp.dot(
                h, whh, preferred_element_type=jnp.float32)      # (Bp, 4H)
            sig = jax.nn.sigmoid(gates)           # full 128-lane EUP op
            tnh = jnp.tanh(gates)                 # full 128-lane EUP op
            # PyTorch gate order: i, f, g, o
            i_g = sig[:, 0 * H:1 * H]
            f_g = sig[:, 1 * H:2 * H]
            g_g = tnh[:, 2 * H:3 * H]
            o_g = sig[:, 3 * H:4 * H]
            c = f_g * c + i_g * g_g
            h = o_g * jnp.tanh(c)
            if layer < num_layers - 1:
                seq_scr[t * Bp:(t + 1) * Bp, :] = h   # stays in VMEM
        hn = h
        if layer < num_layers - 1:
            cur_in = seq_scr[...]                 # feeds next layer, no HBM traffic
        # TODO(synk): inter-layer dropout (p=0.25, train mode) omitted here.

    # ------- BatchNorm1d (train-mode batch statistics, real rows only) + ReLU -------
    row_ids = jax.lax.broadcasted_iota(jnp.int32, (Bp, H), 0)
    valid = (row_ids < B_real).astype(jnp.float32)
    inv_n = 1.0 / float(B_real)
    mean = jnp.sum(hn * valid, axis=0, keepdims=True) * inv_n
    diff = (hn - mean) * valid
    var = jnp.sum(diff * diff, axis=0, keepdims=True) * inv_n     # biased (train mode)
    xhat = (hn - mean) * jax.lax.rsqrt(var + 1e-5)
    bn = xhat * gamma_ref[...] + beta_ref[...]
    act = jnp.maximum(bn, 0.0)

    # ------------------------------ Linear + Softplus ------------------------------
    y = jnp.dot(act, wfc_ref[...], preferred_element_type=jnp.float32) + bfc_ref[...]
    sp = jnp.where(y > 20.0, y, jnp.log1p(jnp.exp(jnp.minimum(y, 20.0))))
    out_ref[...] = sp.astype(out_ref.dtype)


# ----------------------------------- wrapper ---------------------------------------
def lstm_model_forward(x_bti, lstm_params, gamma, beta, w_fc, b_fc):
    """x_bti: (B, T, I) batch-first, like the PyTorch module. Returns (B, O)."""
    B, T, I = x_bti.shape
    num_layers = len(lstm_params)
    H = lstm_params[0][1].shape[1]                 # w_hh: (4H, H)
    O = w_fc.shape[0]
    Bp = ((B + 7) // 8) * 8                        # pad batch to a full sublane group

    # time-major, zero-pad batch to Bp rows, flatten to (T*Bp, I)
    x_tbi = jnp.transpose(x_bti, (1, 0, 2)).astype(jnp.float32)
    x_pad = jnp.pad(x_tbi, ((0, 0), (0, Bp - B), (0, 0)))
    x_flat = x_pad.reshape(T * Bp, I)

    args = [x_flat]
    in_specs = [pl.BlockSpec((T * Bp, I), lambda: (0, 0))]
    for layer, (w_ih, w_hh, b_ih, b_hh) in enumerate(lstm_params):
        in_dim = I if layer == 0 else H
        args += [
            jnp.asarray(w_ih.T, jnp.float32),                        # (in_dim, 4H)
            jnp.asarray(w_hh.T, jnp.float32),                        # (H, 4H)
            jnp.asarray((b_ih + b_hh).reshape(1, 4 * H), jnp.float32),
        ]
        in_specs += [
            pl.BlockSpec((in_dim, 4 * H), lambda: (0, 0)),
            pl.BlockSpec((H, 4 * H), lambda: (0, 0)),
            pl.BlockSpec((1, 4 * H), lambda: (0, 0)),
        ]
    args += [
        gamma.reshape(1, H).astype(jnp.float32),
        beta.reshape(1, H).astype(jnp.float32),
        jnp.asarray(w_fc.T, jnp.float32),                            # (H, O)
        b_fc.reshape(1, O).astype(jnp.float32),
    ]
    in_specs += [
        pl.BlockSpec((1, H), lambda: (0, 0)),
        pl.BlockSpec((1, H), lambda: (0, 0)),
        pl.BlockSpec((H, O), lambda: (0, 0)),
        pl.BlockSpec((1, O), lambda: (0, 0)),
    ]

    kernel = functools.partial(_fused_kernel, T=T, Bp=Bp, B_real=B, H=H,
                               num_layers=num_layers)
    out_pad = pl.pallas_call(
        kernel,
        out_shape=jax.ShapeDtypeStruct((Bp, O), jnp.float32),
        in_specs=in_specs,
        out_specs=pl.BlockSpec((Bp, O), lambda: (0, 0)),
        scratch_shapes=[pltpu.VMEM((T * Bp, H), jnp.float32)],
    )(*args)
    return out_pad[:B]


# ------------------------------ pure-JAX reference ---------------------------------
def reference_forward(x_bti, lstm_params, gamma, beta, w_fc, b_fc):
    B = x_bti.shape[0]
    seq = x_bti
    for (w_ih, w_hh, b_ih, b_hh) in lstm_params:
        H = w_ih.shape[0] // 4

        def step(carry, xt):
            h, c = carry
            gates = xt @ w_ih.T + h @ w_hh.T + b_ih + b_hh
            i, f, g, o = jnp.split(gates, 4, axis=-1)
            i = jax.nn.sigmoid(i); f = jax.nn.sigmoid(f)
            g = jnp.tanh(g); o = jax.nn.sigmoid(o)
            c = f * c + i * g
            h = o * jnp.tanh(c)
            return (h, c), h

        init = (jnp.zeros((B, H)), jnp.zeros((B, H)))
        _, outs = jax.lax.scan(step, init, jnp.transpose(seq, (1, 0, 2)))
        seq = jnp.transpose(outs, (1, 0, 2))
    hn = seq[:, -1, :]
    mean = hn.mean(0)
    var = ((hn - mean) ** 2).mean(0)
    bn = (hn - mean) / jnp.sqrt(var + 1e-5) * gamma + beta
    act = jnp.maximum(bn, 0.0)
    y = act @ w_fc.T + b_fc
    return jax.nn.softplus(y)


# -------------------------------------- main ----------------------------------------
if __name__ == "__main__":
    # module config: full_ivs=False, use_exog=False
    latent_dim = 8
    input_size = 2 * latent_dim        # 16
    output_size = 2 * latent_dim       # 16
    hidden_size = 32
    num_layers = 2
    B, T = 4, 8

    key = jax.random.PRNGKey(0)

    def xavier_normal(k, shape):
        fan_out, fan_in = shape
        std = math.sqrt(2.0 / (fan_in + fan_out))
        return std * jax.random.normal(k, shape, jnp.float32)

    lstm_params = []
    for layer in range(num_layers):
        in_dim = input_size if layer == 0 else hidden_size
        key, k1, k2 = jax.random.split(key, 3)
        w_ih = xavier_normal(k1, (4 * hidden_size, in_dim))
        w_hh = xavier_normal(k2, (4 * hidden_size, hidden_size))
        b_ih = jnp.zeros((4 * hidden_size,), jnp.float32)
        b_hh = jnp.zeros((4 * hidden_size,), jnp.float32)
        lstm_params.append((w_ih, w_hh, b_ih, b_hh))

    key, kf, kx = jax.random.split(key, 3)
    w_fc = xavier_normal(kf, (output_size, hidden_size))
    b_fc = jnp.zeros((output_size,), jnp.float32)
    gamma = jnp.ones((hidden_size,), jnp.float32)
    beta = jnp.zeros((hidden_size,), jnp.float32)

    x = jax.random.normal(kx, (B, T, input_size), jnp.float32)

    forward = jax.jit(lstm_model_forward)
    out = forward(x, lstm_params, gamma, beta, w_fc, b_fc)
    out = jax.block_until_ready(out)

    ref = reference_forward(x, lstm_params, gamma, beta, w_fc, b_fc)
    assert out.shape == (B, output_size)
    assert jnp.allclose(out, ref, rtol=1e-4, atol=1e-4), "mismatch vs reference"

    print("KERNEL_OK")
</pallas_src>

<mosaic_0001>
module attributes {stable_mosaic.version = 11 : i64} {
  func.func @_fused_kernel(%arg0: memref<64x16xf32, #tpu.memory_space<vmem>>, %arg1: memref<16x128xf32, #tpu.memory_space<vmem>>, %arg2: memref<32x128xf32, #tpu.memory_space<vmem>>, %arg3: memref<1x128xf32, #tpu.memory_space<vmem>>, %arg4: memref<32x128xf32, #tpu.memory_space<vmem>>, %arg5: memref<32x128xf32, #tpu.memory_space<vmem>>, %arg6: memref<1x128xf32, #tpu.memory_space<vmem>>, %arg7: memref<1x32xf32, #tpu.memory_space<vmem>>, %arg8: memref<1x32xf32, #tpu.memory_space<vmem>>, %arg9: memref<32x16xf32, #tpu.memory_space<vmem>>, %arg10: memref<1x16xf32, #tpu.memory_space<vmem>>, %arg11: memref<8x16xf32, #tpu.memory_space<vmem>>, %arg12: memref<64x32xf32, #tpu.memory_space<vmem>>) attributes {dimension_semantics = [], scalar_prefetch = 0 : i64, scratch_operands = 1 : i64, tpu.core_type = #tpu.core_type<tc>} {
    %c0 = arith.constant 0 : index
    %c0_0 = arith.constant 0 : index
    %0 = vector.load %arg0[%c0, %c0_0] : memref<64x16xf32, #tpu.memory_space<vmem>>, vector<64x16xf32>
    %c0_1 = arith.constant 0 : index
    %c0_2 = arith.constant 0 : index
    %1 = vector.load %arg1[%c0_1, %c0_2] : memref<16x128xf32, #tpu.memory_space<vmem>>, vector<16x128xf32>
    %c0_3 = arith.constant 0 : index
    %c0_4 = arith.constant 0 : index
    %2 = vector.load %arg2[%c0_3, %c0_4] : memref<32x128xf32, #tpu.memory_space<vmem>>, vector<32x128xf32>
    %c0_5 = arith.constant 0 : index
    %c0_6 = arith.constant 0 : index
    %3 = vector.load %arg3[%c0_5, %c0_6] : memref<1x128xf32, #tpu.memory_space<vmem>>, vector<1x128xf32>
    %cst = arith.constant dense<0.000000e+00> : vector<64x128xf32>
    %4 = tpu.matmul %0, %1, %cst {dimension_numbers = #tpu.dot_dimension_numbers<[1], [0], [0], [1], [0, 0, 1, 1], [], []>} : vector<64x16xf32>, vector<16x128xf32>, vector<64x128xf32> -> vector<64x128xf32>
    %5 = vector.broadcast %3 : vector<1x128xf32> to vector<64x128xf32>
    %6 = arith.addf %4, %5 : vector<64x128xf32>
    %cst_7 = arith.constant 0.000000e+00 : f32
    %7 = vector.broadcast %cst_7 : f32 to vector<8x32xf32>
    %cst_8 = arith.constant 0.000000e+00 : f32
    %8 = vector.broadcast %cst_8 : f32 to vector<8x32xf32>
    %9 = vector.extract_strided_slice %6 {offsets = [0, 0], sizes = [8, 128], strides = [1, 1]} : vector<64x128xf32> to vector<8x128xf32>
    %cst_9 = arith.constant dense<0.000000e+00> : vector<8x128xf32>
    %10 = tpu.matmul %7, %2, %cst_9 {dimension_numbers = #tpu.dot_dimension_numbers<[1], [0], [0], [1], [0, 0, 1, 1], [], []>} : vector<8x32xf32>, vector<32x128xf32>, vector<8x128xf32> -> vector<8x128xf32>
    %11 = arith.addf %9, %10 : vector<8x128xf32>
    %12 = arith.negf %11 : vector<8x128xf32>
    %13 = math.exp %12 : vector<8x128xf32>
    %cst_10 = arith.constant 1.000000e+00 : f32
    %14 = vector.broadcast %cst_10 : f32 to vector<8x128xf32>
    %15 = arith.addf %14, %13 : vector<8x128xf32>
    %16 = arith.divf %14, %15 : vector<8x128xf32>
    %17 = math.tanh %11 : vector<8x128xf32>
    %18 = vector.extract_strided_slice %16 {offsets = [0, 0], sizes = [8, 32], strides = [1, 1]} : vector<8x128xf32> to vector<8x32xf32>
    %19 = vector.extract_strided_slice %16 {offsets = [0, 32], sizes = [8, 32], strides = [1, 1]} : vector<8x128xf32> to vector<8x32xf32>
    %20 = vector.extract_strided_slice %17 {offsets = [0, 64], sizes = [8, 32], strides = [1, 1]} : vector<8x128xf32> to vector<8x32xf32>
    %21 = vector.extract_strided_slice %16 {offsets = [0, 96], sizes = [8, 32], strides = [1, 1]} : vector<8x128xf32> to vector<8x32xf32>
    %22 = arith.mulf %19, %8 : vector<8x32xf32>
    %23 = arith.mulf %18, %20 : vector<8x32xf32>
    %24 = arith.addf %22, %23 : vector<8x32xf32>
    %25 = math.tanh %24 : vector<8x32xf32>
    %26 = arith.mulf %21, %25 : vector<8x32xf32>
    %c0_11 = arith.constant 0 : index
    %c0_12 = arith.constant 0 : index
    %27 = vector.load %arg12[%c0_11, %c0_12] : memref<64x32xf32, #tpu.memory_space<vmem>>, vector<8x32xf32>
    tpu.vector_store %arg12[%c0_11, %c0_12], %26 {strides = array<i32>} : memref<64x32xf32, #tpu.memory_space<vmem>>, vector<8x32xf32>,
    %28 = vector.extract_strided_slice %6 {offsets = [8, 0], sizes = [8, 128], strides = [1, 1]} : vector<64x128xf32> to vector<8x128xf32>
    %cst_13 = arith.constant dense<0.000000e+00> : vector<8x128xf32>
    %29 = tpu.matmul %26, %2, %cst_13 {dimension_numbers = #tpu.dot_dimension_numbers<[1], [0], [0], [1], [0, 0, 1, 1], [], []>} : vector<8x32xf32>, vector<32x128xf32>, vector<8x128xf32> -> vector<8x128xf32>
    %30 = arith.addf %28, %29 : vector<8x128xf32>
    %31 = arith.negf %30 : vector<8x128xf32>
    %32 = math.exp %31 : vector<8x128xf32>
    %cst_14 = arith.constant 1.000000e+00 : f32
    %33 = vector.broadcast %cst_14 : f32 to vector<8x128xf32>
    %34 = arith.addf %33, %32 : vector<8x128xf32>
    %35 = arith.divf %33, %34 : vector<8x128xf32>
    %36 = math.tanh %30 : vector<8x128xf32>
    %37 = vector.extract_strided_slice %35 {offsets = [0, 0], sizes = [8, 32], strides = [1, 1]} : vector<8x128xf32> to vector<8x32xf32>
    %38 = vector.extract_strided_slice %35 {offsets = [0, 32], sizes = [8, 32], strides = [1, 1]} : vector<8x128xf32> to vector<8x32xf32>
    %39 = vector.extract_strided_slice %36 {offsets = [0, 64], sizes = [8, 32], strides = [1, 1]} : vector<8x128xf32> to vector<8x32xf32>
    %40 = vector.extract_strided_slice %35 {offsets = [0, 96], sizes = [8, 32], strides = [1, 1]} : vector<8x128xf32> to vector<8x32xf32>
    %41 = arith.mulf %38, %24 : vector<8x32xf32>
    %42 = arith.mulf %37, %39 : vector<8x32xf32>
    %43 = arith.addf %41, %42 : vector<8x32xf32>
    %44 = math.tanh %43 : vector<8x32xf32>
    %45 = arith.mulf %40, %44 : vector<8x32xf32>
    %c8 = arith.constant 8 : index
    %c0_15 = arith.constant 0 : index
    %46 = vector.load %arg12[%c8, %c0_15] : memref<64x32xf32, #tpu.memory_space<vmem>>, vector<8x32xf32>
    tpu.vector_store %arg12[%c8, %c0_15], %45 {strides = array<i32>} : memref<64x32xf32, #tpu.memory_space<vmem>>, vector<8x32xf32>,
    %47 = vector.extract_strided_slice %6 {offsets = [16, 0], sizes = [8, 128], strides = [1, 1]} : vector<64x128xf32> to vector<8x128xf32>
    %cst_16 = arith.constant dense<0.000000e+00> : vector<8x128xf32>
    %48 = tpu.matmul %45, %2, %cst_16 {dimension_numbers = #tpu.dot_dimension_numbers<[1], [0], [0], [1], [0, 0, 1, 1], [], []>} : vector<8x32xf32>, vector<32x128xf32>, vector<8x128xf32> -> vector<8x128xf32>
    %49 = arith.addf %47, %48 : vector<8x128xf32>
    %50 = arith.negf %49 : vector<8x128xf32>
    %51 = math.exp %50 : vector<8x128xf32>
    %cst_17 = arith.constant 1.000000e+00 : f32
    %52 = vector.broadcast %cst_17 : f32 to vector<8x128xf32>
    %53 = arith.addf %52, %51 : vector<8x128xf32>
    %54 = arith.divf %52, %53 : vector<8x128xf32>
    %55 = math.tanh %49 : vector<8x128xf32>
    %56 = vector.extract_strided_slice %54 {offsets = [0, 0], sizes = [8, 32], strides = [1, 1]} : vector<8x128xf32> to vector<8x32xf32>
    %57 = vector.extract_strided_slice %54 {offsets = [0, 32], sizes = [8, 32], strides = [1, 1]} : vector<8x128xf32> to vector<8x32xf32>
    %58 = vector.extract_strided_slice %55 {offsets = [0, 64], sizes = [8, 32], strides = [1, 1]} : vector<8x128xf32> to vector<8x32xf32>
    %59 = vector.extract_strided_slice %54 {offsets = [0, 96], sizes = [8, 32], strides = [1, 1]} : vector<8x128xf32> to vector<8x32xf32>
    %60 = arith.mulf %57, %43 : vector<8x32xf32>
    %61 = arith.mulf %56, %58 : vector<8x32xf32>
    %62 = arith.addf %60, %61 : vector<8x32xf32>
    %63 = math.tanh %62 : vector<8x32xf32>
    %64 = arith.mulf %59, %63 : vector<8x32xf32>
    %c16 = arith.constant 16 : index
    %c0_18 = arith.constant 0 : index
    %65 = vector.load %arg12[%c16, %c0_18] : memref<64x32xf32, #tpu.memory_space<vmem>>, vector<8x32xf32>
    tpu.vector_store %arg12[%c16, %c0_18], %64 {strides = array<i32>} : memref<64x32xf32, #tpu.memory_space<vmem>>, vector<8x32xf32>,
    %66 = vector.extract_strided_slice %6 {offsets = [24, 0], sizes = [8, 128], strides = [1, 1]} : vector<64x128xf32> to vector<8x128xf32>
    %cst_19 = arith.constant dense<0.000000e+00> : vector<8x128xf32>
    %67 = tpu.matmul %64, %2, %cst_19 {dimension_numbers = #tpu.dot_dimension_numbers<[1], [0], [0], [1], [0, 0, 1, 1], [], []>} : vector<8x32xf32>, vector<32x128xf32>, vector<8x128xf32> -> vector<8x128xf32>
    %68 = arith.addf %66, %67 : vector<8x128xf32>
    %69 = arith.negf %68 : vector<8x128xf32>
    %70 = math.exp %69 : vector<8x128xf32>
    %cst_20 = arith.constant 1.000000e+00 : f32
    %71 = vector.broadcast %cst_20 : f32 to vector<8x128xf32>
    %72 = arith.addf %71, %70 : vector<8x128xf32>
    %73 = arith.divf %71, %72 : vector<8x128xf32>
    %74 = math.tanh %68 : vector<8x128xf32>
    %75 = vector.extract_strided_slice %73 {offsets = [0, 0], sizes = [8, 32], strides = [1, 1]} : vector<8x128xf32> to vector<8x32xf32>
    %76 = vector.extract_strided_slice %73 {offsets = [0, 32], sizes = [8, 32], strides = [1, 1]} : vector<8x128xf32> to vector<8x32xf32>
    %77 = vector.extract_strided_slice %74 {offsets = [0, 64], sizes = [8, 32], strides = [1, 1]} : vector<8x128xf32> to vector<8x32xf32>
    %78 = vector.extract_strided_slice %73 {offsets = [0, 96], sizes = [8, 32], strides = [1, 1]} : vector<8x128xf32> to vector<8x32xf32>
    %79 = arith.mulf %76, %62 : vector<8x32xf32>
    %80 = arith.mulf %75, %77 : vector<8x32xf32>
    %81 = arith.addf %79, %80 : vector<8x32xf32>
    %82 = math.tanh %81 : vector<8x32xf32>
    %83 = arith.mulf %78, %82 : vector<8x32xf32>
    %c24 = arith.constant 24 : index
    %c0_21 = arith.constant 0 : index
    %84 = vector.load %arg12[%c24, %c0_21] : memref<64x32xf32, #tpu.memory_space<vmem>>, vector<8x32xf32>
    tpu.vector_store %arg12[%c24, %c0_21], %83 {strides = array<i32>} : memref<64x32xf32, #tpu.memory_space<vmem>>, vector<8x32xf32>,
    %85 = vector.extract_strided_slice %6 {offsets = [32, 0], sizes = [8, 128], strides = [1, 1]} : vector<64x128xf32> to vector<8x128xf32>
    %cst_22 = arith.constant dense<0.000000e+00> : vector<8x128xf32>
    %86 = tpu.matmul %83, %2, %cst_22 {dimension_numbers = #tpu.dot_dimension_numbers<[1], [0], [0], [1], [0, 0, 1, 1], [], []>} : vector<8x32xf32>, vector<32x128xf32>, vector<8x128xf32> -> vector<8x128xf32>
    %87 = arith.addf %85, %86 : vector<8x128xf32>
    %88 = arith.negf %87 : vector<8x128xf32>
    %89 = math.exp %88 : vector<8x128xf32>
    %cst_23 = arith.constant 1.000000e+00 : f32
    %90 = vector.broadcast %cst_23 : f32 to vector<8x128xf32>
    %91 = arith.addf %90, %89 : vector<8x128xf32>
    %92 = arith.divf %90, %91 : vector<8x128xf32>
    %93 = math.tanh %87 : vector<8x128xf32>
    %94 = vector.extract_strided_slice %92 {offsets = [0, 0], sizes = [8, 32], strides = [1, 1]} : vector<8x128xf32> to vector<8x32xf32>
    %95 = vector.extract_strided_slice %92 {offsets = [0, 32], sizes = [8, 32], strides = [1, 1]} : vector<8x128xf32> to vector<8x32xf32>
    %96 = vector.extract_strided_slice %93 {offsets = [0, 64], sizes = [8, 32], strides = [1, 1]} : vector<8x128xf32> to vector<8x32xf32>
    %97 = vector.extract_strided_slice %92 {offsets = [0, 96], sizes = [8, 32], strides = [1, 1]} : vector<8x128xf32> to vector<8x32xf32>
    %98 = arith.mulf %95, %81 : vector<8x32xf32>
    %99 = arith.mulf %94, %96 : vector<8x32xf32>
    %100 = arith.addf %98, %99 : vector<8x32xf32>
    %101 = math.tanh %100 : vector<8x32xf32>
    %102 = arith.mulf %97, %101 : vector<8x32xf32>
    %c32 = arith.constant 32 : index
    %c0_24 = arith.constant 0 : index
    %103 = vector.load %arg12[%c32, %c0_24] : memref<64x32xf32, #tpu.memory_space<vmem>>, vector<8x32xf32>
    tpu.vector_store %arg12[%c32, %c0_24], %102 {strides = array<i32>} : memref<64x32xf32, #tpu.memory_space<vmem>>, vector<8x32xf32>,
    %104 = vector.extract_strided_slice %6 {offsets = [40, 0], sizes = [8, 128], strides = [1, 1]} : vector<64x128xf32> to vector<8x128xf32>
    %cst_25 = arith.constant dense<0.000000e+00> : vector<8x128xf32>
    %105 = tpu.matmul %102, %2, %cst_25 {dimension_numbers = #tpu.dot_dimension_numbers<[1], [0], [0], [1], [0, 0, 1, 1], [], []>} : vector<8x32xf32>, vector<32x128xf32>, vector<8x128xf32> -> vector<8x128xf32>
    %106 = arith.addf %104, %105 : vector<8x128xf32>
    %107 = arith.negf %106 : vector<8x128xf32>
    %108 = math.exp %107 : vector<8x128xf32>
    %cst_26 = arith.constant 1.000000e+00 : f32
    %109 = vector.broadcast %cst_26 : f32 to vector<8x128xf32>
    %110 = arith.addf %109, %108 : vector<8x128xf32>
    %111 = arith.divf %109, %110 : vector<8x128xf32>
    %112 = math.tanh %106 : vector<8x128xf32>
    %113 = vector.extract_strided_slice %111 {offsets = [0, 0], sizes = [8, 32], strides = [1, 1]} : vector<8x128xf32> to vector<8x32xf32>
    %114 = vector.extract_strided_slice %111 {offsets = [0, 32], sizes = [8, 32], strides = [1, 1]} : vector<8x128xf32> to vector<8x32xf32>
    %115 = vector.extract_strided_slice %112 {offsets = [0, 64], sizes = [8, 32], strides = [1, 1]} : vector<8x128xf32> to vector<8x32xf32>
    %116 = vector.extract_strided_slice %111 {offsets = [0, 96], sizes = [8, 32], strides = [1, 1]} : vector<8x128xf32> to vector<8x32xf32>
    %117 = arith.mulf %114, %100 : vector<8x32xf32>
    %118 = arith.mulf %113, %115 : vector<8x32xf32>
    %119 = arith.addf %117, %118 : vector<8x32xf32>
    %120 = math.tanh %119 : vector<8x32xf32>
    %121 = arith.mulf %116, %120 : vector<8x32xf32>
    %c40 = arith.constant 40 : index
    %c0_27 = arith.constant 0 : index
    %122 = vector.load %arg12[%c40, %c0_27] : memref<64x32xf32, #tpu.memory_space<vmem>>, vector<8x32xf32>
    tpu.vector_store %arg12[%c40, %c0_27], %121 {strides = array<i32>} : memref<64x32xf32, #tpu.memory_space<vmem>>, vector<8x32xf32>,
    %123 = vector.extract_strided_slice %6 {offsets = [48, 0], sizes = [8, 128], strides = [1, 1]} : vector<64x128xf32> to vector<8x128xf32>
    %cst_28 = arith.constant dense<0.000000e+00> : vector<8x128xf32>
    %124 = tpu.matmul %121, %2, %cst_28 {dimension_numbers = #tpu.dot_dimension_numbers<[1], [0], [0], [1], [0, 0, 1, 1], [], []>} : vector<8x32xf32>, vector<32x128xf32>, vector<8x128xf32> -> vector<8x128xf32>
    %125 = arith.addf %123, %124 : vector<8x128xf32>
    %126 = arith.negf %125 : vector<8x128xf32>
    %127 = math.exp %126 : vector<8x128xf32>
    %cst_29 = arith.constant 1.000000e+00 : f32
    %128 = vector.broadcast %cst_29 : f32 to vector<8x128xf32>
    %129 = arith.addf %128, %127 : vector<8x128xf32>
    %130 = arith.divf %128, %129 : vector<8x128xf32>
    %131 = math.tanh %125 : vector<8x128xf32>
    %132 = vector.extract_strided_slice %130 {offsets = [0, 0], sizes = [8, 32], strides = [1, 1]} : vector<8x128xf32> to vector<8x32xf32>
    %133 = vector.extract_strided_slice %130 {offsets = [0, 32], sizes = [8, 32], strides = [1, 1]} : vector<8x128xf32> to vector<8x32xf32>
    %134 = vector.extract_strided_slice %131 {offsets = [0, 64], sizes = [8, 32], strides = [1, 1]} : vector<8x128xf32> to vector<8x32xf32>
    %135 = vector.extract_strided_slice %130 {offsets = [0, 96], sizes = [8, 32], strides = [1, 1]} : vector<8x128xf32> to vector<8x32xf32>
    %136 = arith.mulf %133, %119 : vector<8x32xf32>
    %137 = arith.mulf %132, %134 : vector<8x32xf32>
    %138 = arith.addf %136, %137 : vector<8x32xf32>
    %139 = math.tanh %138 : vector<8x32xf32>
    %140 = arith.mulf %135, %139 : vector<8x32xf32>
    %c48 = arith.constant 48 : index
    %c0_30 = arith.constant 0 : index
    %141 = vector.load %arg12[%c48, %c0_30] : memref<64x32xf32, #tpu.memory_space<vmem>>, vector<8x32xf32>
    tpu.vector_store %arg12[%c48, %c0_30], %140 {strides = array<i32>} : memref<64x32xf32, #tpu.memory_space<vmem>>, vector<8x32xf32>,
    %142 = vector.extract_strided_slice %6 {offsets = [56, 0], sizes = [8, 128], strides = [1, 1]} : vector<64x128xf32> to vector<8x128xf32>
    %cst_31 = arith.constant dense<0.000000e+00> : vector<8x128xf32>
    %143 = tpu.matmul %140, %2, %cst_31 {dimension_numbers = #tpu.dot_dimension_numbers<[1], [0], [0], [1], [0, 0, 1, 1], [], []>} : vector<8x32xf32>, vector<32x128xf32>, vector<8x128xf32> -> vector<8x128xf32>
    %144 = arith.addf %142, %143 : vector<8x128xf32>
    %145 = arith.negf %144 : vector<8x128xf32>
    %146 = math.exp %145 : vector<8x128xf32>
    %cst_32 = arith.constant 1.000000e+00 : f32
    %147 = vector.broadcast %cst_32 : f32 to vector<8x128xf32>
    %148 = arith.addf %147, %146 : vector<8x128xf32>
    %149 = arith.divf %147, %148 : vector<8x128xf32>
    %150 = math.tanh %144 : vector<8x128xf32>
    %151 = vector.extract_strided_slice %149 {offsets = [0, 0], sizes = [8, 32], strides = [1, 1]} : vector<8x128xf32> to vector<8x32xf32>
    %152 = vector.extract_strided_slice %149 {offsets = [0, 32], sizes = [8, 32], strides = [1, 1]} : vector<8x128xf32> to vector<8x32xf32>
    %153 = vector.extract_strided_slice %150 {offsets = [0, 64], sizes = [8, 32], strides = [1, 1]} : vector<8x128xf32> to vector<8x32xf32>
    %154 = vector.extract_strided_slice %149 {offsets = [0, 96], sizes = [8, 32], strides = [1, 1]} : vector<8x128xf32> to vector<8x32xf32>
    %155 = arith.mulf %152, %138 : vector<8x32xf32>
    %156 = arith.mulf %151, %153 : vector<8x32xf32>
    %157 = arith.addf %155, %156 : vector<8x32xf32>
    %158 = math.tanh %157 : vector<8x32xf32>
    %159 = arith.mulf %154, %158 : vector<8x32xf32>
    %c56 = arith.constant 56 : index
    %c0_33 = arith.constant 0 : index
    %160 = vector.load %arg12[%c56, %c0_33] : memref<64x32xf32, #tpu.memory_space<vmem>>, vector<8x32xf32>
    tpu.vector_store %arg12[%c56, %c0_33], %159 {strides = array<i32>} : memref<64x32xf32, #tpu.memory_space<vmem>>, vector<8x32xf32>,
    %c0_34 = arith.constant 0 : index
    %c0_35 = arith.constant 0 : index
    %161 = vector.load %arg12[%c0_34, %c0_35] : memref<64x32xf32, #tpu.memory_space<vmem>>, vector<64x32xf32>
    %c0_36 = arith.constant 0 : index
    %c0_37 = arith.constant 0 : index
    %162 = vector.load %arg4[%c0_36, %c0_37] : memref<32x128xf32, #tpu.memory_space<vmem>>, vector<32x128xf32>
    %c0_38 = arith.constant 0 : index
    %c0_39 = arith.constant 0 : index
    %163 = vector.load %arg5[%c0_38, %c0_39] : memref<32x128xf32, #tpu.memory_space<vmem>>, vector<32x128xf32>
    %c0_40 = arith.constant 0 : index
    %c0_41 = arith.constant 0 : index
    %164 = vector.load %arg6[%c0_40, %c0_41] : memref<1x128xf32, #tpu.memory_space<vmem>>, vector<1x128xf32>
    %cst_42 = arith.constant dense<0.000000e+00> : vector<64x128xf32>
    %165 = tpu.matmul %161, %162, %cst_42 {dimension_numbers = #tpu.dot_dimension_numbers<[1], [0], [0], [1], [0, 0, 1, 1], [], []>} : vector<64x32xf32>, vector<32x128xf32>, vector<64x128xf32> -> vector<64x128xf32>
    %166 = vector.broadcast %164 : vector<1x128xf32> to vector<64x128xf32>
    %167 = arith.addf %165, %166 : vector<64x128xf32>
    %cst_43 = arith.constant 0.000000e+00 : f32
    %168 = vector.broadcast %cst_43 : f32 to vector<8x32xf32>
    %cst_44 = arith.constant 0.000000e+00 : f32
    %169 = vector.broadcast %cst_44 : f32 to vector<8x32xf32>
    %170 = vector.extract_strided_slice %167 {offsets = [0, 0], sizes = [8, 128], strides = [1, 1]} : vector<64x128xf32> to vector<8x128xf32>
    %cst_45 = arith.constant dense<0.000000e+00> : vector<8x128xf32>
    %171 = tpu.matmul %168, %163, %cst_45 {dimension_numbers = #tpu.dot_dimension_numbers<[1], [0], [0], [1], [0, 0, 1, 1], [], []>} : vector<8x32xf32>, vector<32x128xf32>, vector<8x128xf32> -> vector<8x128xf32>
    %172 = arith.addf %170, %171 : vector<8x128xf32>
    %173 = arith.negf %172 : vector<8x128xf32>
    %174 = math.exp %173 : vector<8x128xf32>
    %cst_46 = arith.constant 1.000000e+00 : f32
    %175 = vector.broadcast %cst_46 : f32 to vector<8x128xf32>
    %176 = arith.addf %175, %174 : vector<8x128xf32>
    %177 = arith.divf %175, %176 : vector<8x128xf32>
    %178 = math.tanh %172 : vector<8x128xf32>
    %179 = vector.extract_strided_slice %177 {offsets = [0, 0], sizes = [8, 32], strides = [1, 1]} : vector<8x128xf32> to vector<8x32xf32>
    %180 = vector.extract_strided_slice %177 {offsets = [0, 32], sizes = [8, 32], strides = [1, 1]} : vector<8x128xf32> to vector<8x32xf32>
    %181 = vector.extract_strided_slice %178 {offsets = [0, 64], sizes = [8, 32], strides = [1, 1]} : vector<8x128xf32> to vector<8x32xf32>
    %182 = vector.extract_strided_slice %177 {offsets = [0, 96], sizes = [8, 32], strides = [1, 1]} : vector<8x128xf32> to vector<8x32xf32>
    %183 = arith.mulf %180, %169 : vector<8x32xf32>
    %184 = arith.mulf %179, %181 : vector<8x32xf32>
    %185 = arith.addf %183, %184 : vector<8x32xf32>
    %186 = math.tanh %185 : vector<8x32xf32>
    %187 = arith.mulf %182, %186 : vector<8x32xf32>
    %188 = vector.extract_strided_slice %167 {offsets = [8, 0], sizes = [8, 128], strides = [1, 1]} : vector<64x128xf32> to vector<8x128xf32>
    %cst_47 = arith.constant dense<0.000000e+00> : vector<8x128xf32>
    %189 = tpu.matmul %187, %163, %cst_47 {dimension_numbers = #tpu.dot_dimension_numbers<[1], [0], [0], [1], [0, 0, 1, 1], [], []>} : vector<8x32xf32>, vector<32x128xf32>, vector<8x128xf32> -> vector<8x128xf32>
    %190 = arith.addf %188, %189 : vector<8x128xf32>
    %191 = arith.negf %190 : vector<8x128xf32>
    %192 = math.exp %191 : vector<8x128xf32>
    %cst_48 = arith.constant 1.000000e+00 : f32
    %193 = vector.broadcast %cst_48 : f32 to vector<8x128xf32>
    %194 = arith.addf %193, %192 : vector<8x128xf32>
    %195 = arith.divf %193, %194 : vector<8x128xf32>
    %196 = math.tanh %190 : vector<8x128xf32>
    %197 = vector.extract_strided_slice %195 {offsets = [0, 0], sizes = [8, 32], strides = [1, 1]} : vector<8x128xf32> to vector<8x32xf32>
    %198 = vector.extract_strided_slice %195 {offsets = [0, 32], sizes = [8, 32], strides = [1, 1]} : vector<8x128xf32> to vector<8x32xf32>
    %199 = vector.extract_strided_slice %196 {offsets = [0, 64], sizes = [8, 32], strides = [1, 1]} : vector<8x128xf32> to vector<8x32xf32>
    %200 = vector.extract_strided_slice %195 {offsets = [0, 96], sizes = [8, 32], strides = [1, 1]} : vector<8x128xf32> to vector<8x32xf32>
    %201 = arith.mulf %198, %185 : vector<8x32xf32>
    %202 = arith.mulf %197, %199 : vector<8x32xf32>
    %203 = arith.addf %201, %202 : vector<8x32xf32>
    %204 = math.tanh %203 : vector<8x32xf32>
    %205 = arith.mulf %200, %204 : vector<8x32xf32>
    %206 = vector.extract_strided_slice %167 {offsets = [16, 0], sizes = [8, 128], strides = [1, 1]} : vector<64x128xf32> to vector<8x128xf32>
    %cst_49 = arith.constant dense<0.000000e+00> : vector<8x128xf32>
    %207 = tpu.matmul %205, %163, %cst_49 {dimension_numbers = #tpu.dot_dimension_numbers<[1], [0], [0], [1], [0, 0, 1, 1], [], []>} : vector<8x32xf32>, vector<32x128xf32>, vector<8x128xf32> -> vector<8x128xf32>
    %208 = arith.addf %206, %207 : vector<8x128xf32>
    %209 = arith.negf %208 : vector<8x128xf32>
    %210 = math.exp %209 : vector<8x128xf32>
    %cst_50 = arith.constant 1.000000e+00 : f32
    %211 = vector.broadcast %cst_50 : f32 to vector<8x128xf32>
    %212 = arith.addf %211, %210 : vector<8x128xf32>
    %213 = arith.divf %211, %212 : vector<8x128xf32>
    %214 = math.tanh %208 : vector<8x128xf32>
    %215 = vector.extract_strided_slice %213 {offsets = [0, 0], sizes = [8, 32], strides = [1, 1]} : vector<8x128xf32> to vector<8x32xf32>
    %216 = vector.extract_strided_slice %213 {offsets = [0, 32], sizes = [8, 32], strides = [1, 1]} : vector<8x128xf32> to vector<8x32xf32>
    %217 = vector.extract_strided_slice %214 {offsets = [0, 64], sizes = [8, 32], strides = [1, 1]} : vector<8x128xf32> to vector<8x32xf32>
    %218 = vector.extract_strided_slice %213 {offsets = [0, 96], sizes = [8, 32], strides = [1, 1]} : vector<8x128xf32> to vector<8x32xf32>
    %219 = arith.mulf %216, %203 : vector<8x32xf32>
    %220 = arith.mulf %215, %217 : vector<8x32xf32>
    %221 = arith.addf %219, %220 : vector<8x32xf32>
    %222 = math.tanh %221 : vector<8x32xf32>
    %223 = arith.mulf %218, %222 : vector<8x32xf32>
    %224 = vector.extract_strided_slice %167 {offsets = [24, 0], sizes = [8, 128], strides = [1, 1]} : vector<64x128xf32> to vector<8x128xf32>
    %cst_51 = arith.constant dense<0.000000e+00> : vector<8x128xf32>
    %225 = tpu.matmul %223, %163, %cst_51 {dimension_numbers = #tpu.dot_dimension_numbers<[1], [0], [0], [1], [0, 0, 1, 1], [], []>} : vector<8x32xf32>, vector<32x128xf32>, vector<8x128xf32> -> vector<8x128xf32>
    %226 = arith.addf %224, %225 : vector<8x128xf32>
    %227 = arith.negf %226 : vector<8x128xf32>
    %228 = math.exp %227 : vector<8x128xf32>
    %cst_52 = arith.constant 1.000000e+00 : f32
    %229 = vector.broadcast %cst_52 : f32 to vector<8x128xf32>
    %230 = arith.addf %229, %228 : vector<8x128xf32>
    %231 = arith.divf %229, %230 : vector<8x128xf32>
    %232 = math.tanh %226 : vector<8x128xf32>
    %233 = vector.extract_strided_slice %231 {offsets = [0, 0], sizes = [8, 32], strides = [1, 1]} : vector<8x128xf32> to vector<8x32xf32>
    %234 = vector.extract_strided_slice %231 {offsets = [0, 32], sizes = [8, 32], strides = [1, 1]} : vector<8x128xf32> to vector<8x32xf32>
    %235 = vector.extract_strided_slice %232 {offsets = [0, 64], sizes = [8, 32], strides = [1, 1]} : vector<8x128xf32> to vector<8x32xf32>
    %236 = vector.extract_strided_slice %231 {offsets = [0, 96], sizes = [8, 32], strides = [1, 1]} : vector<8x128xf32> to vector<8x32xf32>
    %237 = arith.mulf %234, %221 : vector<8x32xf32>
    %238 = arith.mulf %233, %235 : vector<8x32xf32>
    %239 = arith.addf %237, %238 : vector<8x32xf32>
    %240 = math.tanh %239 : vector<8x32xf32>
    %241 = arith.mulf %236, %240 : vector<8x32xf32>
    %242 = vector.extract_strided_slice %167 {offsets = [32, 0], sizes = [8, 128], strides = [1, 1]} : vector<64x128xf32> to vector<8x128xf32>
    %cst_53 = arith.constant dense<0.000000e+00> : vector<8x128xf32>
    %243 = tpu.matmul %241, %163, %cst_53 {dimension_numbers = #tpu.dot_dimension_numbers<[1], [0], [0], [1], [0, 0, 1, 1], [], []>} : vector<8x32xf32>, vector<32x128xf32>, vector<8x128xf32> -> vector<8x128xf32>
    %244 = arith.addf %242, %243 : vector<8x128xf32>
    %245 = arith.negf %244 : vector<8x128xf32>
    %246 = math.exp %245 : vector<8x128xf32>
    %cst_54 = arith.constant 1.000000e+00 : f32
    %247 = vector.broadcast %cst_54 : f32 to vector<8x128xf32>
    %248 = arith.addf %247, %246 : vector<8x128xf32>
    %249 = arith.divf %247, %248 : vector<8x128xf32>
    %250 = math.tanh %244 : vector<8x128xf32>
    %251 = vector.extract_strided_slice %249 {offsets = [0, 0], sizes = [8, 32], strides = [1, 1]} : vector<8x128xf32> to vector<8x32xf32>
    %252 = vector.extract_strided_slice %249 {offsets = [0, 32], sizes = [8, 32], strides = [1, 1]} : vector<8x128xf32> to vector<8x32xf32>
    %253 = vector.extract_strided_slice %250 {offsets = [0, 64], sizes = [8, 32], strides = [1, 1]} : vector<8x128xf32> to vector<8x32xf32>
    %254 = vector.extract_strided_slice %249 {offsets = [0, 96], sizes = [8, 32], strides = [1, 1]} : vector<8x128xf32> to vector<8x32xf32>
    %255 = arith.mulf %252, %239 : vector<8x32xf32>
    %256 = arith.mulf %251, %253 : vector<8x32xf32>
    %257 = arith.addf %255, %256 : vector<8x32xf32>
    %258 = math.tanh %257 : vector<8x32xf32>
    %259 = arith.mulf %254, %258 : vector<8x32xf32>
    %260 = vector.extract_strided_slice %167 {offsets = [40, 0], sizes = [8, 128], strides = [1, 1]} : vector<64x128xf32> to vector<8x128xf32>
    %cst_55 = arith.constant dense<0.000000e+00> : vector<8x128xf32>
    %261 = tpu.matmul %259, %163, %cst_55 {dimension_numbers = #tpu.dot_dimension_numbers<[1], [0], [0], [1], [0, 0, 1, 1], [], []>} : vector<8x32xf32>, vector<32x128xf32>, vector<8x128xf32> -> vector<8x128xf32>
    %262 = arith.addf %260, %261 : vector<8x128xf32>
    %263 = arith.negf %262 : vector<8x128xf32>
    %264 = math.exp %263 : vector<8x128xf32>
    %cst_56 = arith.constant 1.000000e+00 : f32
    %265 = vector.broadcast %cst_56 : f32 to vector<8x128xf32>
    %266 = arith.addf %265, %264 : vector<8x128xf32>
    %267 = arith.divf %265, %266 : vector<8x128xf32>
    %268 = math.tanh %262 : vector<8x128xf32>
    %269 = vector.extract_strided_slice %267 {offsets = [0, 0], sizes = [8, 32], strides = [1, 1]} : vector<8x128xf32> to vector<8x32xf32>
    %270 = vector.extract_strided_slice %267 {offsets = [0, 32], sizes = [8, 32], strides = [1, 1]} : vector<8x128xf32> to vector<8x32xf32>
    %271 = vector.extract_strided_slice %268 {offsets = [0, 64], sizes = [8, 32], strides = [1, 1]} : vector<8x128xf32> to vector<8x32xf32>
    %272 = vector.extract_strided_slice %267 {offsets = [0, 96], sizes = [8, 32], strides = [1, 1]} : vector<8x128xf32> to vector<8x32xf32>
    %273 = arith.mulf %270, %257 : vector<8x32xf32>
    %274 = arith.mulf %269, %271 : vector<8x32xf32>
    %275 = arith.addf %273, %274 : vector<8x32xf32>
    %276 = math.tanh %275 : vector<8x32xf32>
    %277 = arith.mulf %272, %276 : vector<8x32xf32>
    %278 = vector.extract_strided_slice %167 {offsets = [48, 0], sizes = [8, 128], strides = [1, 1]} : vector<64x128xf32> to vector<8x128xf32>
    %cst_57 = arith.constant dense<0.000000e+00> : vector<8x128xf32>
    %279 = tpu.matmul %277, %163, %cst_57 {dimension_numbers = #tpu.dot_dimension_numbers<[1], [0], [0], [1], [0, 0, 1, 1], [], []>} : vector<8x32xf32>, vector<32x128xf32>, vector<8x128xf32> -> vector<8x128xf32>
    %280 = arith.addf %278, %279 : vector<8x128xf32>
    %281 = arith.negf %280 : vector<8x128xf32>
    %282 = math.exp %281 : vector<8x128xf32>
    %cst_58 = arith.constant 1.000000e+00 : f32
    %283 = vector.broadcast %cst_58 : f32 to vector<8x128xf32>
    %284 = arith.addf %283, %282 : vector<8x128xf32>
    %285 = arith.divf %283, %284 : vector<8x128xf32>
    %286 = math.tanh %280 : vector<8x128xf32>
    %287 = vector.extract_strided_slice %285 {offsets = [0, 0], sizes = [8, 32], strides = [1, 1]} : vector<8x128xf32> to vector<8x32xf32>
    %288 = vector.extract_strided_slice %285 {offsets = [0, 32], sizes = [8, 32], strides = [1, 1]} : vector<8x128xf32> to vector<8x32xf32>
    %289 = vector.extract_strided_slice %286 {offsets = [0, 64], sizes = [8, 32], strides = [1, 1]} : vector<8x128xf32> to vector<8x32xf32>
    %290 = vector.extract_strided_slice %285 {offsets = [0, 96], sizes = [8, 32], strides = [1, 1]} : vector<8x128xf32> to vector<8x32xf32>
    %291 = arith.mulf %288, %275 : vector<8x32xf32>
    %292 = arith.mulf %287, %289 : vector<8x32xf32>
    %293 = arith.addf %291, %292 : vector<8x32xf32>
    %294 = math.tanh %293 : vector<8x32xf32>
    %295 = arith.mulf %290, %294 : vector<8x32xf32>
    %296 = vector.extract_strided_slice %167 {offsets = [56, 0], sizes = [8, 128], strides = [1, 1]} : vector<64x128xf32> to vector<8x128xf32>
    %cst_59 = arith.constant dense<0.000000e+00> : vector<8x128xf32>
    %297 = tpu.matmul %295, %163, %cst_59 {dimension_numbers = #tpu.dot_dimension_numbers<[1], [0], [0], [1], [0, 0, 1, 1], [], []>} : vector<8x32xf32>, vector<32x128xf32>, vector<8x128xf32> -> vector<8x128xf32>
    %298 = arith.addf %296, %297 : vector<8x128xf32>
    %299 = arith.negf %298 : vector<8x128xf32>
    %300 = math.exp %299 : vector<8x128xf32>
    %cst_60 = arith.constant 1.000000e+00 : f32
    %301 = vector.broadcast %cst_60 : f32 to vector<8x128xf32>
    %302 = arith.addf %301, %300 : vector<8x128xf32>
    %303 = arith.divf %301, %302 : vector<8x128xf32>
    %304 = math.tanh %298 : vector<8x128xf32>
    %305 = vector.extract_strided_slice %303 {offsets = [0, 0], sizes = [8, 32], strides = [1, 1]} : vector<8x128xf32> to vector<8x32xf32>
    %306 = vector.extract_strided_slice %303 {offsets = [0, 32], sizes = [8, 32], strides = [1, 1]} : vector<8x128xf32> to vector<8x32xf32>
    %307 = vector.extract_strided_slice %304 {offsets = [0, 64], sizes = [8, 32], strides = [1, 1]} : vector<8x128xf32> to vector<8x32xf32>
    %308 = vector.extract_strided_slice %303 {offsets = [0, 96], sizes = [8, 32], strides = [1, 1]} : vector<8x128xf32> to vector<8x32xf32>
    %309 = arith.mulf %306, %293 : vector<8x32xf32>
    %310 = arith.mulf %305, %307 : vector<8x32xf32>
    %311 = arith.addf %309, %310 : vector<8x32xf32>
    %312 = math.tanh %311 : vector<8x32xf32>
    %313 = arith.mulf %308, %312 : vector<8x32xf32>
    %314 = tpu.iota {dimensions = array<i32: 0>} : vector<8x32xi32>
    %c4_i32 = arith.constant 4 : i32
    %315 = vector.broadcast %c4_i32 : i32 to vector<8x32xi32>
    %316 = arith.cmpi slt, %314, %315 : vector<8x32xi32>
    %317 = arith.extui %316 : vector<8x32xi1> to vector<8x32xi32>
    %318 = arith.sitofp %317 : vector<8x32xi32> to vector<8x32xf32>
    %319 = arith.mulf %313, %318 : vector<8x32xf32>
    %cst_61 = arith.constant dense<0.000000e+00> : vector<32xf32>
    %320 = vector.multi_reduction <add>, %319, %cst_61 [0] : vector<8x32xf32> to vector<32xf32>
    %321 = vector.shape_cast %320 : vector<32xf32> to vector<1x32xf32>
    %cst_62 = arith.constant 2.500000e-01 : f32
    %322 = vector.broadcast %cst_62 : f32 to vector<1x32xf32>
    %323 = arith.mulf %321, %322 : vector<1x32xf32>
    %324 = vector.broadcast %323 : vector<1x32xf32> to vector<8x32xf32>
    %325 = arith.subf %313, %324 : vector<8x32xf32>
    %326 = arith.mulf %325, %318 : vector<8x32xf32>
    %327 = arith.mulf %326, %326 : vector<8x32xf32>
    %cst_63 = arith.constant dense<0.000000e+00> : vector<32xf32>
    %328 = vector.multi_reduction <add>, %327, %cst_63 [0] : vector<8x32xf32> to vector<32xf32>
    %329 = vector.shape_cast %328 : vector<32xf32> to vector<1x32xf32>
    %cst_64 = arith.constant 2.500000e-01 : f32
    %330 = vector.broadcast %cst_64 : f32 to vector<1x32xf32>
    %331 = arith.mulf %329, %330 : vector<1x32xf32>
    %332 = vector.broadcast %323 : vector<1x32xf32> to vector<8x32xf32>
    %333 = arith.subf %313, %332 : vector<8x32xf32>
    %cst_65 = arith.constant 9.99999974E-6 : f32
    %334 = vector.broadcast %cst_65 : f32 to vector<1x32xf32>
    %335 = arith.addf %331, %334 : vector<1x32xf32>
    %336 = math.rsqrt %335 : vector<1x32xf32>
    %337 = vector.broadcast %336 : vector<1x32xf32> to vector<8x32xf32>
    %338 = arith.mulf %333, %337 : vector<8x32xf32>
    %c0_66 = arith.constant 0 : index
    %c0_67 = arith.constant 0 : index
    %339 = vector.load %arg7[%c0_66, %c0_67] : memref<1x32xf32, #tpu.memory_space<vmem>>, vector<1x32xf32>
    %340 = vector.broadcast %339 : vector<1x32xf32> to vector<8x32xf32>
    %341 = arith.mulf %338, %340 : vector<8x32xf32>
    %c0_68 = arith.constant 0 : index
    %c0_69 = arith.constant 0 : index
    %342 = vector.load %arg8[%c0_68, %c0_69] : memref<1x32xf32, #tpu.memory_space<vmem>>, vector<1x32xf32>
    %343 = vector.broadcast %342 : vector<1x32xf32> to vector<8x32xf32>
    %344 = arith.addf %341, %343 : vector<8x32xf32>
    %cst_70 = arith.constant 0.000000e+00 : f32
    %345 = vector.broadcast %cst_70 : f32 to vector<8x32xf32>
    %346 = arith.maximumf %344, %345 : vector<8x32xf32>
    %c0_71 = arith.constant 0 : index
    %c0_72 = arith.constant 0 : index
    %347 = vector.load %arg9[%c0_71, %c0_72] : memref<32x16xf32, #tpu.memory_space<vmem>>, vector<32x16xf32>
    %cst_73 = arith.constant dense<0.000000e+00> : vector<8x16xf32>
    %348 = tpu.matmul %346, %347, %cst_73 {dimension_numbers = #tpu.dot_dimension_numbers<[1], [0], [0], [1], [0, 0, 1, 1], [], []>} : vector<8x32xf32>, vector<32x16xf32>, vector<8x16xf32> -> vector<8x16xf32>
    %c0_74 = arith.constant 0 : index
    %c0_75 = arith.constant 0 : index
    %349 = vector.load %arg10[%c0_74, %c0_75] : memref<1x16xf32, #tpu.memory_space<vmem>>, vector<1x16xf32>
    %350 = vector.broadcast %349 : vector<1x16xf32> to vector<8x16xf32>
    %351 = arith.addf %348, %350 : vector<8x16xf32>
    %cst_76 = arith.constant 2.000000e+01 : f32
    %352 = vector.broadcast %cst_76 : f32 to vector<8x16xf32>
    %353 = arith.cmpf ogt, %351, %352 : vector<8x16xf32>
    %cst_77 = arith.constant 2.000000e+01 : f32
    %354 = vector.broadcast %cst_77 : f32 to vector<8x16xf32>
    %355 = arith.minimumf %351, %354 : vector<8x16xf32>
    %356 = math.exp %355 : vector<8x16xf32>
    %357 = math.log1p %356 : vector<8x16xf32>
    %358 = arith.select %353, %351, %357 : vector<8x16xi1>, vector<8x16xf32>
    %c0_78 = arith.constant 0 : index
    %c0_79 = arith.constant 0 : index
    %359 = vector.load %arg11[%c0_78, %c0_79] : memref<8x16xf32, #tpu.memory_space<vmem>>, vector<8x16xf32>
    tpu.vector_store %arg11[%c0_78, %c0_79], %358 {strides = array<i32>} : memref<8x16xf32, #tpu.memory_space<vmem>>, vector<8x16xf32>,
    return
  }
}

</mosaic_0001>

<bundles_post_ra>
// kernel: lstm_model_forward.1
= control target key start
LH: loop header
LB: loop body
LE: loop exit
PB: predicated region body
PF: predicated region fallthrough
CT: control target
= control target key end

     0   :  { %vm59_vm0 = vcmask 130048   ;;  %v2746_v0 = vmov 0.0|0.0   ;;  %vm2747_vm1 = vmmov 0   ;;  %v2748_v4 = vmov 0.0   ;;  %s2749_s14 = smov 64   ;;  %s2751_s23 = smov 96   ;;  %s3180_s1 = inlined_call_operand.vmem [shape: f32[16,128], index: 1, kind: input, shape index: {}]   ;;  %s3181_s2 = inlined_call_operand.vmem [shape: f32[32,128], index: 2, kind: input, shape index: {}]   ;;  %s3182_s0 = inlined_call_operand.vmem [shape: f32[64,16], index: 0, kind: input, shape index: {}]   ;;  %s3183_s3 = inlined_call_operand.vmem [shape: f32[1,128], index: 3, kind: input, shape index: {}]   ;;  %s3184_s4 = inlined_call_operand.vmem [shape: f32[32,128], index: 4, kind: input, shape index: {}]   ;;  %s3185_s5 = inlined_call_operand.vmem [shape: f32[32,128], index: 5, kind: input, shape index: {}]   ;;  %s3186_s6 = inlined_call_operand.vmem [shape: f32[1,128], index: 6, kind: input, shape index: {}]   ;;  %s3187_s7 = inlined_call_operand.vmem [shape: f32[1,32], index: 7, kind: input, shape index: {}]   ;;  %s3188_s8 = inlined_call_operand.vmem [shape: f32[1,32], index: 8, kind: input, shape index: {}]   ;;  %s3189_s9 = inlined_call_operand.vmem [shape: f32[32,16], index: 9, kind: input, shape index: {}]   ;;  %s3190_s10 = inlined_call_operand.vmem [shape: f32[1,16], index: 10, kind: input, shape index: {}]   ;;  %s3191_s11 = inlined_call_operand.vmem [shape: f32[8,16], index: 11, kind: output, shape index: {}]  }
   0x1   :  { %2496 = vmatprep.subr.bf16.mxu1 %v2746_v0  ;;  %v46_v1 = vld [vmem:[%s3180_s1] sm:$0xff]  ;;  %v47_v2 = vld [vmem:[%s3180_s1 + $0x8] sm:$0xff]  ;;  %2293 = vmatprep.mubr.msk.f32.mxu1 %vm2747_vm1, %v2748_v4  ;;  %v50_v9 = vld [vmem:[%s3181_s2 + $0x10] sm:$0xff]  ;;  %vm189_vm2 = vcmask 261120   ;;  %vm1960_vm4 = vcmask 1048320  }
   0x2   :  { %v48_v3 = vld [vmem:[%s3181_s2] sm:$0xff]  ;;  %v2492_v5 = vpack.c.bf16 %v47_v2, %v46_v1  ;;  %v49_v6 = vld [vmem:[%s3181_s2 + $0x8] sm:$0xff]  ;;  %v51_v10 = vld [vmem:[%s3181_s2 + $0x18] sm:$0xff] }
   0x3   :  { %v38_v7 = vld [vmem:[%s3182_s0] sm:$0xff]  ;;  %v2830_v8 = vpack.c.bf16 %v49_v6, %v48_v3  ;;  %v39_v11 = vld [vmem:[%s3182_s0 + $0x8] sm:$0xff]  ;;  %v2843_v12 = vpack.c.bf16 %v51_v10, %v50_v9  ;;  %v40_v48 = vld [vmem:[%s3182_s0 + $0x10] sm:$0xff] }
   0x4   :  { %2273 = vmatprep.mubr.msk.f32.mxu0 %vm59_vm0, %v38_v7  ;;  %2493 = vmatprep.subr.bf16.mxu0 %v2492_v5  ;;  %v2864_v13 = vld [vmem:[%s3183_s3] ss:$0 sm:$0xff]  ;;  %s2750_s3 = smov 32   ;;  %v41_v49 = vld [vmem:[%s3182_s0 + $0x18] sm:$0xff]  ;;  %v43_v51 = vld [vmem:[%s3182_s0 + $0x28] sm:$0xff] }
   0x5   :  { %2498 = vmatpush3.bf16.msra.mxu1 %v2830_v8  ;;  %2495 = vmatpush3.bf16.msra.mxu0 %v2492_v5  ;;  %v42_v50 = vld [vmem:[%s3182_s0 + $0x20] sm:$0xff]  ;;  %v44_v52 = vld [vmem:[%s3182_s0 + $0x30] sm:$0xff]  ;;  %v45_v53 = vld [vmem:[%s3182_s0 + $0x38] sm:$0xff] }
   0x6   :  { %2499 = vmatprep.subr.bf16.mxu1 %v2746_v0  ;;  %2508 = vmatprep.subr.bf16.mxu0 %v2746_v0 }
   0x8   :  { %2274 = vmatmul.mubr.msk.f32.vlgmr.msra.gmra.mrb[0].mxu0 %vm59_vm0, %v39_v11 }
   0x9   :  { %2501 = vmatpush3.bf16.msra.mxu1 %v2843_v12  ;;  %2510 = vmatpush3.bf16.msra.mxu0 %v2830_v8 }
   0xa   :  { %2502 = vmatprep.subr.bf16.mxu1 %v2746_v0  ;;  %2511 = vmatprep.subr.bf16.mxu0 %v2746_v0 }
   0xb   :  { %2276 = vmatprep.mubr.msk.f32.mxu0 %vm59_vm0, %v40_v48 }
   0xc   :  { %2294 = vmatmul.mubr.f32.vlgmr.msra.gmra.mrb[0].mxu1 %v2748_v4  ;;  %2277 = vmatmul.mubr.msk.f32.gmra.mrb[2].mxu0 %vm59_vm0, %v41_v49 }
   0xd   :  { %2504 = vmatpush3.bf16.msra.mxu1 %v2830_v8  ;;  %2304 = vmatprep.mubr.msk.f32.mxu1 %vm2747_vm1, %v2748_v4 }
   0xe   :  { %2505 = vmatprep.subr.bf16.mxu1 %v2746_v0  ;;  %2513 = vmatpush3.bf16.msra.mxu0 %v2843_v12 }
   0xf   :  { %2520 = vmatprep.subr.bf16.mxu0 %v2746_v0  ;;  %2279 = vmatprep.mubr.msk.f32.mxu0 %vm59_vm0, %v42_v50 }
  0x10   :  { %2280 = vmatmul.mubr.msk.f32.gmra.mrb[4].mxu0 %vm59_vm0, %v43_v51 }
  0x11   :  { %2507 = vmatpush3.bf16.msra.mxu1 %v2843_v12  ;;  %2282 = vmatprep.mubr.msk.f32.mxu0 %vm59_vm0, %v44_v52 }
  0x12   :  { %2514 = vmatprep.subr.bf16.mxu1 %v2746_v0 }
  0x14   :  { %2283 = vmatmul.mubr.msk.f32.gmra.mrb[6].mxu0 %vm59_vm0, %v45_v53 }
  0x15   :  { %2315 = vmatprep.mubr.msk.f32.mxu0 %vm2747_vm1, %v2748_v4 }
  0xdb   :  { %v2275_v14 = vpop.f32.mrb[0].mxu0 }
  0xdc   :  { %v150_v15 = vpop.f32.mrb[1].mxu0  ;;  %v156_v34 = vadd.f32 %v2275_v14, %v2864_v13 }
  0xdd   :  { %v151_v16 = vadd.f32 %v2864_v13, %v150_v15 }
  0xdf   :  { %v259_v17 = vpop.f32.mrb[0].mxu1  ;;  %v2278_v57 = vpop.f32.mrb[2].mxu0 }
  0xe0   :  { %v263_v18 = vadd.f32 %v259_v17, %v151_v16  ;;  %v2295_v19 = vpop.f32.mrb[1].mxu1  ;;  %v160_v58 = vpop.f32.mrb[3].mxu0 }
  0xe1   :  { %v161_v1 = vadd.f32 %v2864_v13, %v160_v58 }
  0xe2   :  { %2612 = vtanh.f32 %v263_v18  ;;  %v2118_v21 = vmul.f32 -1.442695, %v263_v18 }
  0xe3   :  { %v2910_v59 = vpop.f32.mrb[4].mxu0 }
  0xe4   :  { %2614 = vpow2.f32 %v2118_v21  ;;  %v2912_v60 = vpop.f32.mrb[5].mxu0 }
  0xe7   :  { %v2914_v61 = vpop.f32.mrb[6].mxu0 }
  0xe8   :  { %v2916_v62 = vpop.f32.mrb[7].mxu0 }
  0xec   :  { %v2613_v20 = vpop.eup %2612 }
  0xed   :  { %273 = vrot.lane.b32.xlu0 %v2613_v20, %s2749_s14 }
  0xee   :  { %v2615_v22 = vpop.eup %2614 }
  0xef   :  { %v267_v23 = vadd.f32 1.0, %v2615_v22 }
  0xf1   :  { %2616 = vrcp.f32 %v267_v23  ;;  %v166_v23 = vadd.f32 %v2278_v57, %v2864_v13 }
  0xfb   :  { %v2617_v24 = vpop.eup %2616 }
  0xfc   :  { %v271_v27 = vmul.f32 0.0, %v2617_v24 }
 0x15f   :  { %v274_v25 = vpop.permute.xlu0 %273 }
 0x160   :  { %v276_v26 = vmul.f32 %v2617_v24, %v274_v25 }
 0x162   :  { %278 = vrot.lane.b32.xlu0 %v276_v26, %s2750_s3 }
 0x1d4   :  { %v279_v28 = vpop.permute.xlu0 %278 }
 0x1d5   :  { %v281_v29 = vadd.f32 %v279_v28, %v271_v27 }
 0x1d7   :  { %2618 = vtanh.f32 %v281_v29 }
 0x1e1   :  { %v2619_v30 = vpop.eup %2618 }
 0x1e2   :  { %284 = vrot.lane.b32.xlu1 %v2619_v30, %s2749_s14 }
 0x254   :  { %v285_v31 = vpop.permute.xlu1 %284 }
 0x255   :  { %v287_v32 = vmul.f32 %v2617_v24, %v285_v31 }
 0x257   :  { %289 = vrot.lane.b32.xlu1 %v287_v32, %s2750_s3 }
 0x2c9   :  { %v290_v33 = vpop.permute.xlu1 %289 }
 0x2ca   :  { %292 = vst.msk [vmem:[#allocation2] sm:$0xff] %vm189_vm2, %v290_v33  ;;  %2305 = vmatmul.mubr.msk.f32.vlgmr.msra.gmra.mrb[2].mxu1 %vm189_vm2, %v290_v33 }
 0x2cb   :  { %2516 = vmatpush3.bf16.msra.mxu1 %v2830_v8  ;;  %2326 = vmatprep.mubr.msk.f32.mxu1 %vm2747_vm1, %v2748_v4 }
 0x2cc   :  { %2517 = vmatprep.subr.bf16.mxu1 %v2746_v0 }
 0x2cf   :  { %2519 = vmatpush3.bf16.msra.mxu1 %v2843_v12 }
 0x2d0   :  { %2526 = vmatprep.subr.bf16.mxu1 %v2746_v0 }
 0x39d   :  { %v361_v35 = vpop.f32.mrb[2].mxu1 }
 0x39e   :  { %v365_v36 = vadd.f32 %v361_v35, %v156_v34  ;;  %v2306_v37 = vpop.f32.mrb[3].mxu1 }
 0x3a0   :  { %2620 = vtanh.f32 %v365_v36  ;;  %v2120_v39 = vmul.f32 -1.442695, %v365_v36 }
 0x3a2   :  { %2622 = vpow2.f32 %v2120_v39 }
 0x3aa   :  { %v2621_v38 = vpop.eup %2620 }
 0x3ab   :  { %375 = vrot.lane.b32.xlu0 %v2621_v38, %s2749_s14 }
 0x3ac   :  { %v2623_v40 = vpop.eup %2622 }
 0x3ad   :  { %v369_v41 = vadd.f32 1.0, %v2623_v40 }
 0x3af   :  { %2624 = vrcp.f32 %v369_v41  ;;  %v171_v41 = vadd.f32 %v2864_v13, %v2912_v60  ;;  %v176_v60 = vadd.f32 %v2910_v59, %v2864_v13 }
 0x3b9   :  { %v2625_v42 = vpop.eup %2624 }
 0x3ba   :  { %v373_v45 = vmul.f32 %v2625_v42, %v281_v29 }
 0x41d   :  { %v376_v43 = vpop.permute.xlu0 %375 }
 0x41e   :  { %v378_v44 = vmul.f32 %v2625_v42, %v376_v43 }
 0x420   :  { %380 = vrot.lane.b32.xlu1 %v378_v44, %s2750_s3 }
 0x492   :  { %v381_v46 = vpop.permute.xlu1 %380 }
 0x493   :  { %v383_v47 = vadd.f32 %v381_v46, %v373_v45 }
 0x495   :  { %2626 = vtanh.f32 %v383_v47 }
 0x49f   :  { %v2627_v54 = vpop.eup %2626 }
 0x4a0   :  { %386 = vrot.lane.b32.xlu0 %v2627_v54, %s2749_s14 }
 0x512   :  { %v387_v55 = vpop.permute.xlu0 %386 }
 0x513   :  { %v389_v56 = vmul.f32 %v2625_v42, %v387_v55 }
 0x515   :  { %391 = vrot.lane.b32.xlu1 %v389_v56, %s2750_s3 }
 0x587   :  { %v392_v63 = vpop.permute.xlu1 %391 }
 0x588   :  { %394 = vst.msk [vmem:[#allocation2 + $0x8] sm:$0xff] %vm189_vm2, %v392_v63  ;;  %2316 = vmatmul.mubr.msk.f32.vlgmr.msra.gmra.mrb[8].mxu0 %vm189_vm2, %v392_v63 }
 0x589   :  { %2522 = vmatpush3.bf16.msra.mxu0 %v2830_v8  ;;  %2337 = vmatprep.mubr.msk.f32.mxu0 %vm2747_vm1, %v2748_v4 }
 0x58a   :  { %2523 = vmatprep.subr.bf16.mxu0 %v2746_v0 }
 0x58d   :  { %2525 = vmatpush3.bf16.msra.mxu0 %v2843_v12 }
 0x58e   :  { %2532 = vmatprep.subr.bf16.mxu0 %v2746_v0 }
 0x65b   :  { %v463_v2 = vpop.f32.mrb[8].mxu0 }
 0x65c   :  { %v467_v3 = vadd.f32 %v463_v2, %v161_v1  ;;  %v2317_v5 = vpop.f32.mrb[9].mxu0 }
 0x65e   :  { %2628 = vtanh.f32 %v467_v3  ;;  %v2122_v7 = vmul.f32 -1.442695, %v467_v3 }
 0x660   :  { %2630 = vpow2.f32 %v2122_v7 }
 0x668   :  { %v2629_v6 = vpop.eup %2628 }
 0x669   :  { %477 = vrot.lane.b32.xlu0 %v2629_v6, %s2749_s14 }
 0x66a   :  { %v2631_v9 = vpop.eup %2630 }
 0x66b   :  { %v471_v10 = vadd.f32 1.0, %v2631_v9 }
 0x66d   :  { %2632 = vrcp.f32 %v471_v10 }
 0x677   :  { %v2633_v11 = vpop.eup %2632 }
 0x678   :  { %v475_v16 = vmul.f32 %v2633_v11, %v383_v47 }
 0x6db   :  { %v478_v14 = vpop.permute.xlu0 %477 }
 0x6dc   :  { %v480_v15 = vmul.f32 %v2633_v11, %v478_v14  ;;  %v1015_v14 = vld [vmem:[%s3184_s4] sm:$0xff] }
 0x6de   :  { %482 = vrot.lane.b32.xlu1 %v480_v15, %s2750_s3  ;;  %v1016_v15 = vld [vmem:[%s3184_s4 + $0x8] sm:$0xff] }
 0x750   :  { %v483_v17 = vpop.permute.xlu1 %482 }
 0x751   :  { %v485_v18 = vadd.f32 %v483_v17, %v475_v16  ;;  %v2544_v16 = vpack.c.bf16 %v1016_v15, %v1015_v14 }
 0x753   :  { %2634 = vtanh.f32 %v485_v18 }
 0x75d   :  { %v2635_v19 = vpop.eup %2634 }
 0x75e   :  { %488 = vrot.lane.b32.xlu0 %v2635_v19, %s2749_s14 }
 0x7d0   :  { %v489_v20 = vpop.permute.xlu0 %488 }
 0x7d1   :  { %v491_v21 = vmul.f32 %v2633_v11, %v489_v20  ;;  %v1017_v20 = vld [vmem:[%s3184_s4 + $0x10] sm:$0xff] }
 0x7d3   :  { %493 = vrot.lane.b32.xlu1 %v491_v21, %s2750_s3  ;;  %v1018_v21 = vld [vmem:[%s3184_s4 + $0x18] sm:$0xff] }
 0x845   :  { %v494_v22 = vpop.permute.xlu1 %493 }
 0x846   :  { %496 = vst.msk [vmem:[#allocation2 + $0x10] sm:$0xff] %vm189_vm2, %v494_v22  ;;  %2327 = vmatmul.mubr.msk.f32.vlgmr.msra.gmra.mrb[4].mxu1 %vm189_vm2, %v494_v22  ;;  %v2548_v22 = vpack.c.bf16 %v1018_v21, %v1017_v20 }
 0x847   :  { %2528 = vmatpush3.bf16.msra.mxu1 %v2830_v8  ;;  %2348 = vmatprep.mubr.msk.f32.mxu1 %vm2747_vm1, %v2748_v4 }
 0x848   :  { %2529 = vmatprep.subr.bf16.mxu1 %v2746_v0 }
 0x84b   :  { %2531 = vmatpush3.bf16.msra.mxu1 %v2843_v12 }
 0x84c   :  { %2538 = vmatprep.subr.bf16.mxu1 %v2746_v0 }
 0x919   :  { %v565_v24 = vpop.f32.mrb[4].mxu1 }
 0x91a   :  { %v569_v25 = vadd.f32 %v565_v24, %v166_v23  ;;  %v2328_v26 = vpop.f32.mrb[5].mxu1  ;;  %v1007_v24 = vld [vmem:[#allocation2] sm:$0xff] }
 0x91b   :  { %v1009_v26 = vld [vmem:[#allocation2 + $0x10] sm:$0xff] }
 0x91c   :  { %2636 = vtanh.f32 %v569_v25  ;;  %v2124_v28 = vmul.f32 -1.442695, %v569_v25  ;;  %v1008_v25 = vld [vmem:[#allocation2 + $0x8] sm:$0xff] }
 0x91e   :  { %2638 = vpow2.f32 %v2124_v28 }
 0x926   :  { %v2637_v27 = vpop.eup %2636 }
 0x927   :  { %579 = vrot.lane.b32.xlu0 %v2637_v27, %s2749_s14 }
 0x928   :  { %v2639_v29 = vpop.eup %2638 }
 0x929   :  { %v573_v30 = vadd.f32 1.0, %v2639_v29 }
 0x92b   :  { %2640 = vrcp.f32 %v573_v30  ;;  %v181_v30 = vadd.f32 %v2864_v13, %v2916_v62 }
 0x935   :  { %v2641_v31 = vpop.eup %2640 }
 0x936   :  { %v577_v34 = vmul.f32 %v2641_v31, %v485_v18 }
 0x999   :  { %v580_v32 = vpop.permute.xlu0 %579 }
 0x99a   :  { %v582_v33 = vmul.f32 %v2641_v31, %v580_v32 }
 0x99c   :  { %584 = vrot.lane.b32.xlu1 %v582_v33, %s2750_s3 }
 0xa0e   :  { %v585_v35 = vpop.permute.xlu1 %584 }
 0xa0f   :  { %v587_v36 = vadd.f32 %v585_v35, %v577_v34 }
 0xa11   :  { %2642 = vtanh.f32 %v587_v36 }
 0xa1b   :  { %v2643_v37 = vpop.eup %2642 }
 0xa1c   :  { %590 = vrot.lane.b32.xlu0 %v2643_v37, %s2749_s14 }
 0xa8e   :  { %v591_v38 = vpop.permute.xlu0 %590 }
 0xa8f   :  { %v593_v39 = vmul.f32 %v2641_v31, %v591_v38 }
 0xa91   :  { %595 = vrot.lane.b32.xlu1 %v593_v39, %s2750_s3 }
 0xb03   :  { %v596_v40 = vpop.permute.xlu1 %595 }
 0xb04   :  { %598 = vst.msk [vmem:[#allocation2 + $0x18] sm:$0xff] %vm189_vm2, %v596_v40  ;;  %2338 = vmatmul.mubr.msk.f32.vlgmr.msra.gmra.mrb[10].mxu0 %vm189_vm2, %v596_v40 }
 0xb05   :  { %2534 = vmatpush3.bf16.msra.mxu0 %v2830_v8  ;;  %2359 = vmatprep.mubr.msk.f32.mxu0 %vm2747_vm1, %v2748_v4 }
 0xb06   :  { %2535 = vmatprep.subr.bf16.mxu0 %v2746_v0 }
 0xb09   :  { %2537 = vmatpush3.bf16.msra.mxu0 %v2843_v12 }
 0xb0a   :  { %2545 = vmatprep.subr.bf16.mxu0 %v2544_v16 }
 0xb0b   :  { %v1010_v27 = vld [vmem:[#allocation2 + $0x18] sm:$0xff] }
 0xbd7   :  { %v667_v42 = vpop.f32.mrb[10].mxu0 }
 0xbd8   :  { %v671_v43 = vadd.f32 %v667_v42, %v171_v41  ;;  %v2339_v44 = vpop.f32.mrb[11].mxu0 }
 0xbda   :  { %2644 = vtanh.f32 %v671_v43  ;;  %v2126_v46 = vmul.f32 -1.442695, %v671_v43 }
 0xbdc   :  { %2646 = vpow2.f32 %v2126_v46 }
 0xbe4   :  { %v2645_v45 = vpop.eup %2644 }
 0xbe5   :  { %681 = vrot.lane.b32.xlu0 %v2645_v45, %s2749_s14 }
 0xbe6   :  { %v2647_v47 = vpop.eup %2646 }
 0xbe7   :  { %v675_v48 = vadd.f32 1.0, %v2647_v47 }
 0xbe9   :  { %2648 = vrcp.f32 %v675_v48 }
 0xbf3   :  { %v2649_v49 = vpop.eup %2648 }
 0xbf4   :  { %v679_v52 = vmul.f32 %v2649_v49, %v587_v36 }
 0xc57   :  { %v682_v50 = vpop.permute.xlu0 %681 }
 0xc58   :  { %v684_v51 = vmul.f32 %v2649_v49, %v682_v50  ;;  %v1019_v50 = vld [vmem:[%s3185_s5] sm:$0xff] }
 0xc5a   :  { %686 = vrot.lane.b32.xlu1 %v684_v51, %s2750_s3  ;;  %v1020_v51 = vld [vmem:[%s3185_s5 + $0x8] sm:$0xff] }
 0xccc   :  { %v687_v53 = vpop.permute.xlu1 %686 }
 0xccd   :  { %v689_v54 = vadd.f32 %v687_v53, %v679_v52  ;;  %v3016_v52 = vpack.c.bf16 %v1020_v51, %v1019_v50  ;;  %v1021_v53 = vld [vmem:[%s3185_s5 + $0x10] sm:$0xff] }
 0xccf   :  { %2650 = vtanh.f32 %v689_v54 }
 0xcd9   :  { %v2651_v55 = vpop.eup %2650 }
 0xcda   :  { %692 = vrot.lane.b32.xlu0 %v2651_v55, %s2749_s14 }
 0xd4c   :  { %v693_v56 = vpop.permute.xlu0 %692 }
 0xd4d   :  { %v695_v57 = vmul.f32 %v2649_v49, %v693_v56 }
 0xd4f   :  { %697 = vrot.lane.b32.xlu1 %v695_v57, %s2750_s3 }
 0xdc1   :  { %v698_v58 = vpop.permute.xlu1 %697 }
 0xdc2   :  { %700 = vst.msk [vmem:[#allocation2 + $0x20] sm:$0xff] %vm189_vm2, %v698_v58  ;;  %2349 = vmatmul.mubr.msk.f32.vlgmr.msra.gmra.mrb[6].mxu1 %vm189_vm2, %v698_v58 }
 0xdc3   :  { %2540 = vmatpush3.bf16.msra.mxu1 %v2830_v8  ;;  %2370 = vmatprep.mubr.msk.f32.mxu1 %vm2747_vm1, %v2748_v4 }
 0xdc4   :  { %2541 = vmatprep.subr.bf16.mxu1 %v2746_v0 }
 0xdc7   :  { %2543 = vmatpush3.bf16.msra.mxu1 %v2843_v12 }
 0xdc8   :  { %2552 = vmatprep.subr.bf16.mxu1 %v2746_v0 }
 0xdc9   :  { %v1011_v28 = vld [vmem:[#allocation2 + $0x20] sm:$0xff] }
 0xe95   :  { %v769_v63 = vpop.f32.mrb[6].mxu1 }
 0xe96   :  { %v773_v1 = vadd.f32 %v769_v63, %v176_v60  ;;  %v2350_v2 = vpop.f32.mrb[7].mxu1  ;;  %v186_v63 = vadd.f32 %v2914_v61, %v2864_v13 }
 0xe98   :  { %2652 = vtanh.f32 %v773_v1  ;;  %v2128_v8 = vmul.f32 -1.442695, %v773_v1 }
 0xe9a   :  { %2654 = vpow2.f32 %v2128_v8  ;;  %v3052_v8 = vld [vmem:[%s3186_s6] ss:$0 sm:$0xff] }
 0xea2   :  { %v2653_v3 = vpop.eup %2652 }
 0xea3   :  { %783 = vrot.lane.b32.xlu0 %v2653_v3, %s2749_s14 }
 0xea4   :  { %v2655_v5 = vpop.eup %2654 }
 0xea5   :  { %v777_v6 = vadd.f32 1.0, %v2655_v5 }
 0xea7   :  { %2656 = vrcp.f32 %v777_v6 }
 0xeb1   :  { %v2657_v7 = vpop.eup %2656 }
 0xeb2   :  { %v781_v10 = vmul.f32 %v2657_v7, %v689_v54  ;;  %v1022_v54 = vld [vmem:[%s3185_s5 + $0x18] sm:$0xff] }
 0xeb3   :  { %v3026_v55 = vpack.c.bf16 %v1022_v54, %v1021_v53 }
 0xf15   :  { %v784_v9 = vpop.permute.xlu0 %783 }
 0xf16   :  { %v786_v12 = vmul.f32 %v2657_v7, %v784_v9 }
 0xf18   :  { %788 = vrot.lane.b32.xlu1 %v786_v12, %s2750_s3 }
 0xf8a   :  { %v789_v11 = vpop.permute.xlu1 %788 }
 0xf8b   :  { %v791_v59 = vadd.f32 %v789_v11, %v781_v10 }
 0xf8d   :  { %2658 = vtanh.f32 %v791_v59 }
 0xf97   :  { %v2659_v17 = vpop.eup %2658 }
 0xf98   :  { %794 = vrot.lane.b32.xlu0 %v2659_v17, %s2749_s14 }
0x100a   :  { %v795_v18 = vpop.permute.xlu0 %794 }
0x100b   :  { %v797_v19 = vmul.f32 %v2657_v7, %v795_v18 }
0x100d   :  { %799 = vrot.lane.b32.xlu1 %v797_v19, %s2750_s3 }
0x107f   :  { %v800_v23 = vpop.permute.xlu1 %799 }
0x1080   :  { %802 = vst.msk [vmem:[#allocation2 + $0x28] sm:$0xff] %vm189_vm2, %v800_v23  ;;  %2360 = vmatmul.mubr.msk.f32.vlgmr.msra.gmra.mrb[12].mxu0 %vm189_vm2, %v800_v23 }
0x1081   :  { %2547 = vmatpush3.bf16.msra.mxu0 %v2544_v16  ;;  %2381 = vmatprep.mubr.msk.f32.mxu0 %vm189_vm2, %v1007_v24 }
0x1082   :  { %2549 = vmatprep.subr.bf16.mxu0 %v2548_v22 }
0x1085   :  { %2551 = vmatpush3.bf16.msra.mxu0 %v2548_v22 }
0x1086   :  { %2564 = vmatprep.subr.bf16.mxu0 %v2746_v0 }
0x1087   :  { %v1012_v29 = vld [vmem:[#allocation2 + $0x28] sm:$0xff] }
0x1088   :  { %2382 = vmatmul.mubr.msk.f32.vlgmr.msra.gmra.mrb[14].mxu0 %vm189_vm2, %v1008_v25 }
0x1089   :  { %2384 = vmatprep.mubr.msk.f32.mxu0 %vm189_vm2, %v1009_v26  ;;  %2566 = vmatpush3.bf16.msra.mxu0 %v3016_v52 }
0x108a   :  { %2567 = vmatprep.subr.bf16.mxu0 %v2746_v0 }
0x108c   :  { %2385 = vmatmul.mubr.msk.f32.gmra.mrb[16].mxu0 %vm189_vm2, %v1010_v27 }
0x108d   :  { %2387 = vmatprep.mubr.msk.f32.mxu0 %vm189_vm2, %v1011_v28  ;;  %2569 = vmatpush3.bf16.msra.mxu0 %v3026_v55 }
0x108e   :  { %2576 = vmatprep.subr.bf16.mxu0 %v2746_v0 }
0x1090   :  { %2388 = vmatmul.mubr.msk.f32.gmra.mrb[18].mxu0 %vm189_vm2, %v1012_v29 }
0x1153   :  { %v871_v31 = vpop.f32.mrb[12].mxu0 }
0x1154   :  { %v875_v32 = vadd.f32 %v871_v31, %v181_v30  ;;  %v2361_v33 = vpop.f32.mrb[13].mxu0 }
0x1156   :  { %2660 = vtanh.f32 %v875_v32  ;;  %v2130_v41 = vmul.f32 -1.442695, %v875_v32 }
0x1158   :  { %2662 = vpow2.f32 %v2130_v41 }
0x115b   :  { %v2994_v34 = vpop.f32.mrb[14].mxu0 }
0x115c   :  { %v1120_v35 = vpop.f32.mrb[15].mxu0 }
0x115d   :  { %v1121_v5 = vadd.f32 %v3052_v8, %v1120_v35 }
0x115f   :  { %v2996_v36 = vpop.f32.mrb[16].mxu0 }
0x1160   :  { %v2661_v37 = vpop.eup %2660  ;;  %v2998_v38 = vpop.f32.mrb[17].mxu0 }
0x1161   :  { %885 = vrot.lane.b32.xlu0 %v2661_v37, %s2749_s14  ;;  %v1126_v37 = vadd.f32 %v2994_v34, %v3052_v8 }
0x1162   :  { %v2663_v62 = vpop.eup %2662 }
0x1163   :  { %v3001_v39 = vpop.f32.mrb[18].mxu0  ;;  %v879_v42 = vadd.f32 1.0, %v2663_v62 }
0x1164   :  { %v3003_v40 = vpop.f32.mrb[19].mxu0 }
0x1165   :  { %2664 = vrcp.f32 %v879_v42 }
0x116f   :  { %v2665_v43 = vpop.eup %2664 }
0x1170   :  { %v883_v46 = vmul.f32 %v2665_v43, %v791_v59 }
0x11d3   :  { %v886_v44 = vpop.permute.xlu0 %885 }
0x11d4   :  { %v888_v45 = vmul.f32 %v2665_v43, %v886_v44 }
0x11d6   :  { %890 = vrot.lane.b32.xlu1 %v888_v45, %s2750_s3 }
0x1248   :  { %v891_v47 = vpop.permute.xlu1 %890 }
0x1249   :  { %v3006_v48 = vadd.f32 %v891_v47, %v883_v46 }
0x124b   :  { %2666 = vtanh.f32 %v3006_v48 }
0x1255   :  { %v2667_v49 = vpop.eup %2666 }
0x1256   :  { %896 = vrot.lane.b32.xlu0 %v2667_v49, %s2749_s14 }
0x12c8   :  { %v897_v56 = vpop.permute.xlu0 %896 }
0x12c9   :  { %v899_v57 = vmul.f32 %v2665_v43, %v897_v56 }
0x12cb   :  { %901 = vrot.lane.b32.xlu1 %v899_v57, %s2750_s3 }
0x133d   :  { %v902_v58 = vpop.permute.xlu1 %901 }
0x133e   :  { %904 = vst.msk [vmem:[#allocation2 + $0x30] sm:$0xff] %vm189_vm2, %v902_v58  ;;  %2371 = vmatmul.mubr.msk.f32.vlgmr.msra.gmra.mrb[8].mxu1 %vm189_vm2, %v902_v58 }
0x133f   :  { %2554 = vmatpush3.bf16.msra.mxu1 %v3016_v52  ;;  %2401 = vmatprep.mubr.msk.f32.mxu1 %vm2747_vm1, %v2748_v4 }
0x1340   :  { %2555 = vmatprep.subr.bf16.mxu1 %v2746_v0 }
0x1343   :  { %2557 = vmatpush3.bf16.msra.mxu1 %v3026_v55 }
0x1344   :  { %2558 = vmatprep.subr.bf16.mxu1 %v2746_v0 }
0x1345   :  { %v1013_v60 = vld [vmem:[#allocation2 + $0x30] sm:$0xff] }
0x1346   :  { %2402 = vmatmul.mubr.f32.vlgmr.msra.gmra.mrb[10].mxu1 %v2748_v4  ;;  %2390 = vmatprep.mubr.msk.f32.mxu0 %vm189_vm2, %v1013_v60 }
0x1347   :  { %2560 = vmatpush3.bf16.msra.mxu1 %v3016_v52  ;;  %2412 = vmatprep.mubr.msk.f32.mxu1 %vm2747_vm1, %v2748_v4 }
0x1348   :  { %2561 = vmatprep.subr.bf16.mxu1 %v2746_v0 }
0x134b   :  { %2563 = vmatpush3.bf16.msra.mxu1 %v3026_v55 }
0x134c   :  { %2570 = vmatprep.subr.bf16.mxu1 %v2746_v0 }
0x1411   :  { %v973_v1 = vpop.f32.mrb[8].mxu1 }
0x1412   :  { %v977_v2 = vadd.f32 %v973_v1, %v186_v63  ;;  %v2372_v3 = vpop.f32.mrb[9].mxu1 }
0x1414   :  { %v2132_v20 = vmul.f32 -1.442695, %v977_v2 }
0x1419   :  { %v1225_v6 = vpop.f32.mrb[10].mxu1 }
0x141a   :  { %v1229_v7 = vadd.f32 %v1225_v6, %v1121_v5  ;;  %v2403_v9 = vpop.f32.mrb[11].mxu1 }
0x141c   :  { %2668 = vtanh.f32 %v1229_v7  ;;  %v2142_v10 = vmul.f32 -1.442695, %v1229_v7 }
0x141e   :  { %2670 = vpow2.f32 %v2142_v10 }
0x1426   :  { %v2669_v12 = vpop.eup %2668 }
0x1427   :  { %1239 = vrot.lane.b32.xlu0 %v2669_v12, %s2749_s14 }
0x1428   :  { %v2671_v13 = vpop.eup %2670 }
0x1429   :  { %v1233_v61 = vadd.f32 1.0, %v2671_v13 }
0x142b   :  { %2672 = vrcp.f32 %v1233_v61 }
0x1435   :  { %v2673_v11 = vpop.eup %2672 }
0x1436   :  { %v1237_v15 = vmul.f32 0.0, %v2673_v11 }
0x1499   :  { %v1240_v59 = vpop.permute.xlu0 %1239 }
0x149a   :  { %v1242_v14 = vmul.f32 %v2673_v11, %v1240_v59 }
0x149c   :  { %1244 = vrot.lane.b32.xlu1 %v1242_v14, %s2750_s3 }
0x150e   :  { %v1245_v16 = vpop.permute.xlu1 %1244 }
0x150f   :  { %v1247_v17 = vadd.f32 %v1245_v16, %v1237_v15 }
0x1511   :  { %2674 = vtanh.f32 %v1247_v17 }
0x1512   :  { %2676 = vtanh.f32 %v977_v2  ;;  %v1131_v2 = vadd.f32 %v3052_v8, %v2998_v38 }
0x1513   :  { %2678 = vpow2.f32 %v2132_v20 }
0x151b   :  { %v2675_v18 = vpop.eup %2674 }
0x151c   :  { %1250 = vrot.lane.b32.xlu0 %v2675_v18, %s2749_s14  ;;  %v2677_v19 = vpop.eup %2676 }
0x151d   :  { %v2679_v21 = vpop.eup %2678 }
0x151e   :  { %v981_v22 = vadd.f32 1.0, %v2679_v21 }
0x1520   :  { %987 = vrot.lane.b32.xlu0 %v2677_v19, %s2749_s14  ;;  %2680 = vrcp.f32 %v981_v22  ;;  %v1136_v19 = vadd.f32 %v2996_v36, %v3052_v8 }
0x152a   :  { %v2681_v25 = vpop.eup %2680 }
0x152b   :  { %v985_v29 = vmul.f32 %v2681_v25, %v3006_v48 }
0x158e   :  { %v1251_v23 = vpop.permute.xlu0 %1250 }
0x158f   :  { %v1253_v24 = vmul.f32 %v2673_v11, %v1251_v23 }
0x1591   :  { %1255 = vrot.lane.b32.xlu1 %v1253_v24, %s2750_s3 }
0x1592   :  { %v988_v26 = vpop.permute.xlu0 %987 }
0x1593   :  { %v990_v27 = vmul.f32 %v2681_v25, %v988_v26 }
0x1595   :  { %992 = vrot.lane.b32.xlu0 %v990_v27, %s2750_s3 }
0x1603   :  { %v1256_v28 = vpop.permute.xlu1 %1255 }
0x1604   :  { %2413 = vmatmul.mubr.msk.f32.vlgmr.msra.gmra.mrb[12].mxu1 %vm189_vm2, %v1256_v28 }
0x1605   :  { %2572 = vmatpush3.bf16.msra.mxu1 %v3016_v52  ;;  %2434 = vmatprep.mubr.msk.f32.mxu1 %vm2747_vm1, %v2748_v4 }
0x1606   :  { %2573 = vmatprep.subr.bf16.mxu1 %v2746_v0 }
0x1607   :  { %v993_v30 = vpop.permute.xlu0 %992 }
0x1608   :  { %v995_v31 = vadd.f32 %v993_v30, %v985_v29 }
0x1609   :  { %2575 = vmatpush3.bf16.msra.mxu1 %v3026_v55 }
0x160a   :  { %2682 = vtanh.f32 %v995_v31  ;;  %2582 = vmatprep.subr.bf16.mxu1 %v2746_v0 }
0x1614   :  { %v2683_v32 = vpop.eup %2682 }
0x1615   :  { %998 = vrot.lane.b32.xlu0 %v2683_v32, %s2749_s14 }
0x1687   :  { %v999_v33 = vpop.permute.xlu0 %998 }
0x1688   :  { %v1001_v35 = vmul.f32 %v2681_v25, %v999_v33 }
0x168a   :  { %1003 = vrot.lane.b32.xlu0 %v1001_v35, %s2750_s3 }
0x16d7   :  { %v1325_v41 = vpop.f32.mrb[12].mxu1 }
0x16d8   :  { %v1329_v62 = vadd.f32 %v1325_v41, %v1126_v37  ;;  %v2414_v42 = vpop.f32.mrb[13].mxu1  ;;  %v1141_v41 = vadd.f32 %v3052_v8, %v3003_v40 }
0x16da   :  { %2684 = vtanh.f32 %v1329_v62  ;;  %v2144_v46 = vmul.f32 -1.442695, %v1329_v62 }
0x16dc   :  { %2686 = vpow2.f32 %v2144_v46 }
0x16e4   :  { %v2685_v43 = vpop.eup %2684 }
0x16e5   :  { %1339 = vrot.lane.b32.xlu1 %v2685_v43, %s2749_s14 }
0x16e6   :  { %v2687_v47 = vpop.eup %2686 }
0x16e7   :  { %v1333_v34 = vadd.f32 1.0, %v2687_v47 }
0x16e9   :  { %2688 = vrcp.f32 %v1333_v34 }
0x16f3   :  { %v2689_v48 = vpop.eup %2688 }
0x16f4   :  { %v1337_v51 = vmul.f32 %v2689_v48, %v1247_v17 }
0x16fc   :  { %v1004_v44 = vpop.permute.xlu0 %1003 }
0x16fd   :  { %1006 = vst.msk [vmem:[#allocation2 + $0x38] sm:$0xff] %vm189_vm2, %v1004_v44 }
0x1704   :  { %v1014_v45 = vld [vmem:[#allocation2 + $0x38] sm:$0xff] }
0x1705   :  { %2391 = vmatmul.mubr.msk.f32.gmra.mrb[20].mxu0 %vm189_vm2, %v1014_v45 }
0x1706   :  { %2423 = vmatprep.mubr.msk.f32.mxu0 %vm2747_vm1, %v2748_v4 }
0x1757   :  { %v1340_v49 = vpop.permute.xlu1 %1339 }
0x1758   :  { %v1342_v50 = vmul.f32 %v2689_v48, %v1340_v49 }
0x175a   :  { %1344 = vrot.lane.b32.xlu1 %v1342_v50, %s2750_s3 }
0x17cc   :  { %v1345_v53 = vpop.permute.xlu1 %1344 }
0x17cd   :  { %v1347_v54 = vadd.f32 %v1345_v53, %v1337_v51 }
0x17cf   :  { %2690 = vtanh.f32 %v1347_v54 }
0x17d8   :  { %v3079_v56 = vpop.f32.mrb[20].mxu0 }
0x17d9   :  { %v2691_v57 = vpop.eup %2690  ;;  %v3081_v58 = vpop.f32.mrb[21].mxu0 }
0x17da   :  { %1350 = vrot.lane.b32.xlu1 %v2691_v57, %s2749_s14 }
0x184c   :  { %v1351_v60 = vpop.permute.xlu1 %1350 }
0x184d   :  { %v1353_v63 = vmul.f32 %v2689_v48, %v1351_v60 }
0x184f   :  { %1355 = vrot.lane.b32.xlu1 %v1353_v63, %s2750_s3  ;;  %v1146_v63 = vadd.f32 %v3001_v39, %v3052_v8 }
0x18c1   :  { %v1356_v1 = vpop.permute.xlu1 %1355 }
0x18c2   :  { %2424 = vmatmul.mubr.msk.f32.vlgmr.msra.gmra.mrb[22].mxu0 %vm189_vm2, %v1356_v1 }
0x18c3   :  { %2578 = vmatpush3.bf16.msra.mxu0 %v3016_v52  ;;  %2445 = vmatprep.mubr.msk.f32.mxu0 %vm2747_vm1, %v2748_v4 }
0x18c4   :  { %2579 = vmatprep.subr.bf16.mxu0 %v2746_v0 }
0x18c7   :  { %2581 = vmatpush3.bf16.msra.mxu0 %v3026_v55 }
0x18c8   :  { %2588 = vmatprep.subr.bf16.mxu0 %v2746_v0 }
0x1995   :  { %v1425_v3 = vpop.f32.mrb[22].mxu0 }
0x1996   :  { %v1429_v5 = vadd.f32 %v1425_v3, %v1131_v2  ;;  %v2425_v6 = vpop.f32.mrb[23].mxu0 }
0x1998   :  { %2692 = vtanh.f32 %v1429_v5  ;;  %v2146_v9 = vmul.f32 -1.442695, %v1429_v5 }
0x199a   :  { %2694 = vpow2.f32 %v2146_v9 }
0x19a2   :  { %v2693_v7 = vpop.eup %2692 }
0x19a3   :  { %1439 = vrot.lane.b32.xlu0 %v2693_v7, %s2749_s14 }
0x19a4   :  { %v2695_v12 = vpop.eup %2694 }
0x19a5   :  { %v1433_v10 = vadd.f32 1.0, %v2695_v12 }
0x19a7   :  { %2696 = vrcp.f32 %v1433_v10 }
0x19b1   :  { %v2697_v13 = vpop.eup %2696 }
0x19b2   :  { %v1437_v59 = vmul.f32 %v2697_v13, %v1347_v54 }
0x1a15   :  { %v1440_v61 = vpop.permute.xlu0 %1439 }
0x1a16   :  { %v1442_v11 = vmul.f32 %v2697_v13, %v1440_v61 }
0x1a18   :  { %1444 = vrot.lane.b32.xlu1 %v1442_v11, %s2750_s3 }
0x1a8a   :  { %v1445_v14 = vpop.permute.xlu1 %1444 }
0x1a8b   :  { %v1447_v38 = vadd.f32 %v1445_v14, %v1437_v59 }
0x1a8d   :  { %2698 = vtanh.f32 %v1447_v38 }
0x1a97   :  { %v2699_v15 = vpop.eup %2698 }
0x1a98   :  { %1450 = vrot.lane.b32.xlu0 %v2699_v15, %s2749_s14 }
0x1b0a   :  { %v1451_v16 = vpop.permute.xlu0 %1450 }
0x1b0b   :  { %v1453_v17 = vmul.f32 %v2697_v13, %v1451_v16 }
0x1b0d   :  { %1455 = vrot.lane.b32.xlu1 %v1453_v17, %s2750_s3 }
0x1b7f   :  { %v1456_v18 = vpop.permute.xlu1 %1455 }
0x1b80   :  { %2435 = vmatmul.mubr.msk.f32.vlgmr.msra.gmra.mrb[14].mxu1 %vm189_vm2, %v1456_v18 }
0x1b81   :  { %2584 = vmatpush3.bf16.msra.mxu1 %v3016_v52  ;;  %2456 = vmatprep.mubr.msk.f32.mxu1 %vm2747_vm1, %v2748_v4 }
0x1b82   :  { %2585 = vmatprep.subr.bf16.mxu1 %v2746_v0 }
0x1b85   :  { %2587 = vmatpush3.bf16.msra.mxu1 %v3026_v55 }
0x1b86   :  { %2594 = vmatprep.subr.bf16.mxu1 %v2746_v0 }
0x1c53   :  { %v1525_v20 = vpop.f32.mrb[14].mxu1 }
0x1c54   :  { %v1529_v21 = vadd.f32 %v1525_v20, %v1136_v19  ;;  %v2436_v22 = vpop.f32.mrb[15].mxu1 }
0x1c56   :  { %2700 = vtanh.f32 %v1529_v21  ;;  %v2148_v24 = vmul.f32 -1.442695, %v1529_v21 }
0x1c58   :  { %2702 = vpow2.f32 %v2148_v24 }
0x1c60   :  { %v2701_v23 = vpop.eup %2700 }
0x1c61   :  { %1539 = vrot.lane.b32.xlu0 %v2701_v23, %s2749_s14 }
0x1c62   :  { %v2703_v25 = vpop.eup %2702 }
0x1c63   :  { %v1533_v26 = vadd.f32 1.0, %v2703_v25 }
0x1c65   :  { %2704 = vrcp.f32 %v1533_v26 }
0x1c6f   :  { %v2705_v27 = vpop.eup %2704 }
0x1c70   :  { %v1537_v30 = vmul.f32 %v2705_v27, %v1447_v38  ;;  %v1151_v38 = vadd.f32 %v3052_v8, %v3081_v58 }
0x1cd3   :  { %v1540_v28 = vpop.permute.xlu0 %1539 }
0x1cd4   :  { %v1542_v29 = vmul.f32 %v2705_v27, %v1540_v28 }
0x1cd6   :  { %1544 = vrot.lane.b32.xlu1 %v1542_v29, %s2750_s3 }
0x1d48   :  { %v1545_v31 = vpop.permute.xlu1 %1544 }
0x1d49   :  { %v1547_v36 = vadd.f32 %v1545_v31, %v1537_v30  ;;  %v1156_v31 = vadd.f32 %v3079_v56, %v3052_v8  ;;  %v2158_v8 = vld [vmem:[%s3187_s7] ss:$0 sm:$0xff] }
0x1d4b   :  { %2706 = vtanh.f32 %v1547_v36 }
0x1d55   :  { %v2707_v32 = vpop.eup %2706 }
0x1d56   :  { %1550 = vrot.lane.b32.xlu0 %v2707_v32, %s2749_s14 }
0x1dc8   :  { %v1551_v33 = vpop.permute.xlu0 %1550 }
0x1dc9   :  { %v1553_v35 = vmul.f32 %v2705_v27, %v1551_v33 }
0x1dcb   :  { %1555 = vrot.lane.b32.xlu1 %v1553_v35, %s2750_s3 }
0x1e3d   :  { %v1556_v37 = vpop.permute.xlu1 %1555 }
0x1e3e   :  { %2446 = vmatmul.mubr.msk.f32.vlgmr.msra.gmra.mrb[24].mxu0 %vm189_vm2, %v1556_v37 }
0x1e3f   :  { %2590 = vmatpush3.bf16.msra.mxu0 %v3016_v52  ;;  %2467 = vmatprep.mubr.msk.f32.mxu0 %vm2747_vm1, %v2748_v4 }
0x1e40   :  { %2591 = vmatprep.subr.bf16.mxu0 %v2746_v0 }
0x1e43   :  { %2593 = vmatpush3.bf16.msra.mxu0 %v3026_v55 }
0x1e44   :  { %2600 = vmatprep.subr.bf16.mxu0 %v2746_v0 }
0x1f11   :  { %v1625_v62 = vpop.f32.mrb[24].mxu0 }
0x1f12   :  { %v1629_v42 = vadd.f32 %v1625_v62, %v1141_v41  ;;  %v2447_v43 = vpop.f32.mrb[25].mxu0 }
0x1f14   :  { %2708 = vtanh.f32 %v1629_v42  ;;  %v2150_v45 = vmul.f32 -1.442695, %v1629_v42 }
0x1f16   :  { %2710 = vpow2.f32 %v2150_v45 }
0x1f1e   :  { %v2709_v44 = vpop.eup %2708 }
0x1f1f   :  { %1639 = vrot.lane.b32.xlu0 %v2709_v44, %s2749_s14 }
0x1f20   :  { %v2711_v46 = vpop.eup %2710 }
0x1f21   :  { %v1633_v47 = vadd.f32 1.0, %v2711_v46 }
0x1f23   :  { %2712 = vrcp.f32 %v1633_v47 }
0x1f2d   :  { %v2713_v34 = vpop.eup %2712 }
0x1f2e   :  { %v1637_v50 = vmul.f32 %v2713_v34, %v1547_v36 }
0x1f91   :  { %v1640_v48 = vpop.permute.xlu0 %1639 }
0x1f92   :  { %v1642_v49 = vmul.f32 %v2713_v34, %v1640_v48  ;;  %v2004_v48 = vld [vmem:[%s3189_s9] sm:$0xff] }
0x1f94   :  { %1644 = vrot.lane.b32.xlu1 %v1642_v49, %s2750_s3  ;;  %v2005_v49 = vld [vmem:[%s3189_s9 + $0x8] sm:$0xff] }
0x2006   :  { %v1645_v51 = vpop.permute.xlu1 %1644 }
0x2007   :  { %v1647_v40 = vadd.f32 %v1645_v51, %v1637_v50  ;;  %v2006_v50 = vld [vmem:[%s3189_s9 + $0x10] sm:$0xff]  ;;  %v2601_v51 = vpack.c.bf16 %v2005_v49, %v2004_v48 }
0x2009   :  { %2714 = vtanh.f32 %v1647_v40 }
0x2013   :  { %v2715_v53 = vpop.eup %2714 }
0x2014   :  { %1650 = vrot.lane.b32.xlu0 %v2715_v53, %s2749_s14 }
0x2086   :  { %v1651_v54 = vpop.permute.xlu0 %1650 }
0x2087   :  { %v1653_v57 = vmul.f32 %v2713_v34, %v1651_v54  ;;  %v2159_v34 = vld [vmem:[%s3188_s8] ss:$0 sm:$0xff]  ;;  %v1954_v54 = vlaneseq }
0x2089   :  { %1655 = vrot.lane.b32.xlu1 %v1653_v57, %s2750_s3  ;;  %v1955_v57 = vshrl.u32 %v1954_v54, 7 }
0x208b   :  { %vm1956_vm3 = vcmp.lt.s32.totalorder %v1955_v57, 4 }
0x20fb   :  { %v1656_v60 = vpop.permute.xlu1 %1655 }
0x20fc   :  { %2457 = vmatmul.mubr.msk.f32.vlgmr.msra.gmra.mrb[16].mxu1 %vm189_vm2, %v1656_v60  ;;  %v2157_v60 = vsel %vm1956_vm3, 1.0, %v2748_v4 }
0x20fd   :  { %2596 = vmatpush3.bf16.msra.mxu1 %v3016_v52  ;;  %2478 = vmatprep.mubr.msk.f32.mxu1 %vm2747_vm1, %v2748_v4 }
0x20fe   :  { %2597 = vmatprep.subr.bf16.mxu1 %v2746_v0 }
0x2101   :  { %2599 = vmatpush3.bf16.msra.mxu1 %v3026_v55 }
0x21cf   :  { %v1725_v1 = vpop.f32.mrb[16].mxu1 }
0x21d0   :  { %v1729_v2 = vadd.f32 %v1725_v1, %v1146_v63  ;;  %v2458_v3 = vpop.f32.mrb[17].mxu1 }
0x21d2   :  { %2716 = vtanh.f32 %v1729_v2  ;;  %v2152_v6 = vmul.f32 -1.442695, %v1729_v2 }
0x21d4   :  { %2718 = vpow2.f32 %v2152_v6 }
0x21dc   :  { %v2717_v5 = vpop.eup %2716 }
0x21dd   :  { %1739 = vrot.lane.b32.xlu0 %v2717_v5, %s2749_s14 }
0x21de   :  { %v2719_v52 = vpop.eup %2718 }
0x21df   :  { %v1733_v7 = vadd.f32 1.0, %v2719_v52 }
0x21e1   :  { %2720 = vrcp.f32 %v1733_v7 }
0x21eb   :  { %v2721_v9 = vpop.eup %2720 }
0x21ec   :  { %v1737_v55 = vmul.f32 %v2721_v9, %v1647_v40  ;;  %v2007_v40 = vld [vmem:[%s3189_s9 + $0x18] sm:$0xff] }
0x21ed   :  { %v2604_v53 = vpack.c.bf16 %v2007_v40, %v2006_v50 }
0x224f   :  { %v1740_v12 = vpop.permute.xlu0 %1739 }
0x2250   :  { %v1742_v10 = vmul.f32 %v2721_v9, %v1740_v12 }
0x2252   :  { %1744 = vrot.lane.b32.xlu1 %v1742_v10, %s2750_s3 }
0x22c4   :  { %v1745_v13 = vpop.permute.xlu1 %1744 }
0x22c5   :  { %v1747_v39 = vadd.f32 %v1745_v13, %v1737_v55 }
0x22c7   :  { %2722 = vtanh.f32 %v1747_v39 }
0x22d1   :  { %v2723_v61 = vpop.eup %2722 }
0x22d2   :  { %1750 = vrot.lane.b32.xlu0 %v2723_v61, %s2749_s14 }
0x2344   :  { %v1751_v11 = vpop.permute.xlu0 %1750 }
0x2345   :  { %v1753_v59 = vmul.f32 %v2721_v9, %v1751_v11 }
0x2347   :  { %1755 = vrot.lane.b32.xlu1 %v1753_v59, %s2750_s3 }
0x23b9   :  { %v1756_v14 = vpop.permute.xlu1 %1755 }
0x23ba   :  { %2468 = vmatmul.mubr.msk.f32.vlgmr.msra.gmra.mrb[26].mxu0 %vm189_vm2, %v1756_v14 }
0x23bb   :  { %2489 = vmatprep.mubr.msk.f32.mxu0 %vm2747_vm1, %v2748_v4  ;;  %2602 = vmatpush3.bf16.msra.mxu0 %v2601_v51 }
0x23bc   :  { %2603 = vmatprep.subr.bf16.mxu0 %v2746_v0 }
0x23bf   :  { %2605 = vmatpush3.bf16.msra.mxu0 %v2604_v53 }
0x248d   :  { %v1825_v15 = vpop.f32.mrb[26].mxu0 }
0x248e   :  { %v1829_v16 = vadd.f32 %v1825_v15, %v1151_v38  ;;  %v2469_v17 = vpop.f32.mrb[27].mxu0 }
0x2490   :  { %2724 = vtanh.f32 %v1829_v16  ;;  %v2154_v19 = vmul.f32 -1.442695, %v1829_v16 }
0x2492   :  { %2726 = vpow2.f32 %v2154_v19 }
0x249a   :  { %v2725_v18 = vpop.eup %2724 }
0x249b   :  { %1839 = vrot.lane.b32.xlu0 %v2725_v18, %s2749_s14 }
0x249c   :  { %v2727_v20 = vpop.eup %2726 }
0x249d   :  { %v1833_v21 = vadd.f32 1.0, %v2727_v20 }
0x249f   :  { %2728 = vrcp.f32 %v1833_v21 }
0x24a9   :  { %v2729_v22 = vpop.eup %2728 }
0x24aa   :  { %v1837_v25 = vmul.f32 %v2729_v22, %v1747_v39 }
0x250d   :  { %v1840_v23 = vpop.permute.xlu0 %1839 }
0x250e   :  { %v1842_v24 = vmul.f32 %v2729_v22, %v1840_v23 }
0x2510   :  { %1844 = vrot.lane.b32.xlu1 %v1842_v24, %s2750_s3 }
0x2582   :  { %v1845_v26 = vpop.permute.xlu1 %1844 }
0x2583   :  { %v1847_v58 = vadd.f32 %v1845_v26, %v1837_v25  ;;  %v2160_v25 = vld [vmem:[%s3190_s10] ss:$0 sm:$0xff] }
0x2585   :  { %2730 = vtanh.f32 %v1847_v58 }
0x258f   :  { %v2731_v27 = vpop.eup %2730 }
0x2590   :  { %1850 = vrot.lane.b32.xlu0 %v2731_v27, %s2749_s14 }
0x2602   :  { %v1851_v28 = vpop.permute.xlu0 %1850 }
0x2603   :  { %v1853_v29 = vmul.f32 %v2729_v22, %v1851_v28 }
0x2605   :  { %1855 = vrot.lane.b32.xlu1 %v1853_v29, %s2750_s3 }
0x2677   :  { %v1856_v30 = vpop.permute.xlu1 %1855 }
0x2678   :  { %2479 = vmatmul.mubr.msk.f32.vlgmr.msra.gmra.mrb[18].mxu1 %vm189_vm2, %v1856_v30 }
0x274b   :  { %v1925_v36 = vpop.f32.mrb[18].mxu1 }
0x274c   :  { %v1929_v32 = vadd.f32 %v1925_v36, %v1156_v31  ;;  %v2480_v33 = vpop.f32.mrb[19].mxu1 }
0x274e   :  { %2732 = vtanh.f32 %v1929_v32  ;;  %v2156_v37 = vmul.f32 -1.442695, %v1929_v32 }
0x2750   :  { %2734 = vpow2.f32 %v2156_v37 }
0x2758   :  { %v2733_v35 = vpop.eup %2732 }
0x2759   :  { %1939 = vrot.lane.b32.xlu0 %v2733_v35, %s2749_s14 }
0x275a   :  { %v2735_v41 = vpop.eup %2734 }
0x275b   :  { %v1933_v62 = vadd.f32 1.0, %v2735_v41 }
0x275d   :  { %2736 = vrcp.f32 %v1933_v62 }
0x2767   :  { %v2737_v42 = vpop.eup %2736 }
0x2768   :  { %v1937_v56 = vmul.f32 %v2737_v42, %v1847_v58 }
0x27cb   :  { %v1940_v43 = vpop.permute.xlu0 %1939 }
0x27cc   :  { %v1942_v44 = vmul.f32 %v2737_v42, %v1940_v43 }
0x27ce   :  { %1944 = vrot.lane.b32.xlu1 %v1942_v44, %s2750_s3 }
0x27d2   :  { %1989 = vrot.lane.b32.xlu1 %v2158_v8, %s2751_s23 }
0x2840   :  { %v1945_v45 = vpop.permute.xlu1 %1944 }
0x2841   :  { %v1947_v46 = vadd.f32 %v1945_v45, %v1937_v56 }
0x2843   :  { %2738 = vtanh.f32 %v1947_v46 }
0x2844   :  { %v1990_v18 = vpop.permute.xlu1 %1989 }
0x284d   :  { %v2739_v47 = vpop.eup %2738 }
0x284e   :  { %1950 = vrot.lane.b32.xlu0 %v2739_v47, %s2749_s14 }
0x2852   :  { %1999 = vrot.lane.b32.xlu0 %v2159_v34, %s2751_s23 }
0x28c0   :  { %v1951_v63 = vpop.permute.xlu0 %1950 }
0x28c1   :  { %v1953_v1 = vmul.f32 %v2737_v42, %v1951_v63 }
0x28c3   :  { %v1959_v2 = vmul.f32 %v2157_v60, %v1953_v1 }
0x28c4   :  { %v2000_v20 = vpop.permute.xlu0 %1999 }
0x28c5   :  { %v1961_v3 = vsel %vm1960_vm4, %v1959_v2, 0.0 }
0x28c6   :  { %v1962_v5 = vrot.slane %v1961_v3, 4 }
0x28c8   :  { %v1963_v6 = vadd.f32 %v1962_v5, %v1961_v3 }
0x28ca   :  { %v1964_v52 = vrot.slane %v1963_v6, 2 }
0x28cc   :  { %v1965_v7 = vadd.f32 %v1964_v52, %v1963_v6 }
0x28ce   :  { %v1966_v9 = vrot.slane %v1965_v7, 1 }
0x28d0   :  { %v1967_v12 = vadd.f32 %v1966_v9, %v1965_v7 }
0x28d2   :  { %v1968_v10 = vmul.f32 0.25, %v1967_v12 }
0x28d4   :  { %v1969_v55 = vsub.f32 %v1953_v1, %v1968_v10 }
0x28d6   :  { %v1970_v0 = vmul.f32 %v2157_v60, %v1969_v55 }
0x28d8   :  { %v1971_v13 = vmul.f32 %v1970_v0, %v1970_v0 }
0x28da   :  { %v1972_v39 = vsel %vm1960_vm4, %v1971_v13, 0.0 }
0x28db   :  { %v1973_v61 = vrot.slane %v1972_v39, 4 }
0x28dd   :  { %v1974_v11 = vadd.f32 %v1973_v61, %v1972_v39 }
0x28df   :  { %v1975_v59 = vrot.slane %v1974_v11, 2 }
0x28e1   :  { %v1976_v4 = vadd.f32 %v1975_v59, %v1974_v11 }
0x28e3   :  { %v1977_v14 = vrot.slane %v1976_v4, 1 }
0x28e5   :  { %v1978_v38 = vadd.f32 %v1977_v14, %v1976_v4 }
0x28e7   :  { %v1979_v15 = vmul.f32 0.25, %v1978_v38 }
0x28e9   :  { %v1980_v16 = vadd.f32 1e-05, %v1979_v15 }
0x28eb   :  { %2740 = vrsqrt.f32 %v1980_v16 }
0x28f5   :  { %v2741_v17 = vpop.eup %2740 }
0x28f6   :  { %v1982_v19 = vmul.f32 %v2741_v17, %v1969_v55 }
0x28f8   :  { %v1992_v21 = vmul.f32 %v1990_v18, %v1982_v19 }
0x28fa   :  { %v2002_v22 = vadd.f32 %v2000_v20, %v1992_v21 }
0x28fc   :  { %v2003_v23 = vmax.f32 %v2002_v22, 0.0 }
0x28fe   :  { %2016 = vrot.lane.b32.xlu1 %v2003_v23, %s2750_s3 }
0x2970   :  { %v2017_v24 = vpop.permute.xlu1 %2016 }
0x2971   :  { %2490 = vmatmul.mubr.msk.f32.vlgmr.msra.gmra.mrb[28].mxu0 %vm189_vm2, %v2017_v24 }
0x2a44   :  { %v2086_v26 = vpop.f32.mrb[28].mxu0 }
0x2a45   :  { %v2087_v58 = vadd.f32 %v2160_v25, %v2086_v26  ;;  %v2491_v27 = vpop.f32.mrb[29].mxu0 }
0x2a47   :  { %v2091_v28 = vmin.f32 %v2087_v58, 20.0  ;;  %vm2090_vm6 = vcmp.gt.f32.partialorder %v2087_v58, 20.0 }
0x2a49   :  { %v2092_v29 = vmul.f32 1.442695, %v2091_v28 }
0x2a4b   :  { %2742 = vpow2.f32 %v2092_v29 }
0x2a55   :  { %v2743_v30 = vpop.eup %2742 }
0x2a56   :  { %v2094_v31 = vadd.f32 1.0, %v2743_v30  ;;  %v2097_v36 = vmul.f32 -0.5, %v2743_v30  ;;  %v2100_v33 = vand.u32 2147483647, %v2743_v30 }
0x2a58   :  { %2744 = vlog2.f32 %v2094_v31  ;;  %v2098_v32 = vadd.f32 1.0, %v2097_v36  ;;  %vm2101_vm5 = vcmp.lt.f32.partialorder %v2100_v33, 0.0004427343 }
0x2a5a   :  { %v2099_v41 = vmul.f32 %v2743_v30, %v2098_v32 }
0x2a62   :  { %v2745_v35 = vpop.eup %2744 }
0x2a63   :  { %v2096_v37 = vmul.f32 0.6931472, %v2745_v35 }
0x2a65   :  { %v2102_v62 = vsel %vm2101_vm5, %v2099_v41, %v2096_v37 }
0x2a66   :  { %v2103_v42 = vsel %vm2090_vm6, %v2087_v58, %v2102_v62 }
0x2a67   :  { %2104 = vst.msk [vmem:[%s3191_s11] sm:$0xff] %vm59_vm0, %v2103_v42 }

</bundles_post_ra>
